<compile_context>
chip_gen: v5e
topology: v5e:2x2
jax: 0.10.0
libtpu: 0.0.40
codegen_flags: <defaults>
</compile_context>

<pallas_src>
import jax
import jax.numpy as jnp
from jax.experimental import pallas as pl
from jax.experimental.pallas import tpu as pltpu

HIDDEN = 2 ** 6  # inner width of the `model` branch (64)


def _sigmoid(x):
    # exp goes to the EUP slot; explicit form guarantees a clean Mosaic lowering.
    return 1.0 / (1.0 + jnp.exp(-x))


def _phi_kernel(x_ref, x0_ref,
                w1_ref, b1_ref, w2_ref, b2_ref, w3_ref, b3_ref,
                v1_ref, c1_ref, v2_ref, c2_ref,
                out_ref):
    x = x_ref[...].astype(jnp.float32)
    x0 = x0_ref[...].astype(jnp.float32)

    # model branch: Linear -> Sigmoid -> Linear -> Sigmoid -> Linear
    h = _sigmoid(jnp.dot(x, w1_ref[...], preferred_element_type=jnp.float32)
                 + b1_ref[...])
    h = _sigmoid(jnp.dot(h, w2_ref[...], preferred_element_type=jnp.float32)
                 + b2_ref[...])
    out_model = (jnp.dot(h, w3_ref[...], preferred_element_type=jnp.float32)
                 + b3_ref[...])

    # linear branch: Linear -> Sigmoid -> Linear
    g = _sigmoid(jnp.dot(x0, v1_ref[...], preferred_element_type=jnp.float32)
                 + c1_ref[...])
    out_lin = (jnp.dot(g, v2_ref[...], preferred_element_type=jnp.float32)
               + c2_ref[...])

    out_ref[...] = (out_model + out_lin).astype(out_ref.dtype)


def _round_up(n, m):
    return ((n + m - 1) // m) * m


def phi_forward(x, x0, params, *, tm=128, out_dtype=jnp.float32):
    """Fused Phi forward. x: (B, z_dim), x0: (B, data_dim) -> (B, h_dim)."""
    assert x.shape[0] == x0.shape[0], "x and x0 must share the batch dimension"
    b = x.shape[0]
    z_dim = x.shape[1]
    data_dim = x0.shape[1]
    h_dim = params["w3"].shape[1]

    # Row-tile size: multiple of 8 (sublane), capped at 128; pad batch to a
    # multiple of it so every block is full.
    tm = min(tm, _round_up(b, 8))
    b_pad = _round_up(b, tm)
    if b_pad != b:
        x = jnp.pad(x, ((0, b_pad - b), (0, 0)))
        x0 = jnp.pad(x0, ((0, b_pad - b), (0, 0)))

    grid = (b_pad // tm,)

    def row_spec(d):
        return pl.BlockSpec((tm, d), lambda i: (i, 0))

    def resident_spec(arr):
        return pl.BlockSpec(arr.shape, lambda i: (0, 0))

    w1, b1 = params["w1"], params["b1"]
    w2, b2 = params["w2"], params["b2"]
    w3, b3 = params["w3"], params["b3"]
    v1, c1 = params["v1"], params["c1"]
    v2, c2 = params["v2"], params["c2"]

    out = pl.pallas_call(
        _phi_kernel,
        out_shape=jax.ShapeDtypeStruct((b_pad, h_dim), out_dtype),
        grid=grid,
        in_specs=[
            row_spec(z_dim),
            row_spec(data_dim),
            resident_spec(w1), resident_spec(b1),
            resident_spec(w2), resident_spec(b2),
            resident_spec(w3), resident_spec(b3),
            resident_spec(v1), resident_spec(c1),
            resident_spec(v2), resident_spec(c2),
        ],
        out_specs=row_spec(h_dim),
        compiler_params=pltpu.CompilerParams(
            dimension_semantics=("parallel",),   # independent row tiles -> megacore on v7x
            vmem_limit_bytes=32 * 1024 * 1024,
        ),
    )(x, x0, w1, b1, w2, b2, w3, b3, v1, c1, v2, c2)

    return out[:b]


def _phi_ref(x, x0, params):
    """Pure-JAX reference matching the PyTorch module."""
    x = x.astype(jnp.float32)
    x0 = x0.astype(jnp.float32)
    h = _sigmoid(x @ params["w1"] + params["b1"])
    h = _sigmoid(h @ params["w2"] + params["b2"])
    out_model = h @ params["w3"] + params["b3"]
    g = _sigmoid(x0 @ params["v1"] + params["c1"])
    out_lin = g @ params["v2"] + params["c2"]
    return out_model + out_lin


def init_params(key, z_dim, h_dim, data_dim, dtype=jnp.float32):
    """PyTorch-style Linear init; weights stored as (in, out), biases as (1, out)."""
    def lin(k, fan_in, fan_out):
        bound = float(1.0 / (fan_in ** 0.5))
        kw, kb = jax.random.split(k)
        w = jax.random.uniform(kw, (fan_in, fan_out), dtype, -bound, bound)
        b = jax.random.uniform(kb, (1, fan_out), dtype, -bound, bound)
        return w, b

    ks = jax.random.split(key, 5)
    w1, b1 = lin(ks[0], z_dim, HIDDEN)
    w2, b2 = lin(ks[1], HIDDEN, HIDDEN)
    w3, b3 = lin(ks[2], HIDDEN, h_dim)
    v1, c1 = lin(ks[3], data_dim, h_dim)
    v2, c2 = lin(ks[4], h_dim, h_dim)
    return dict(w1=w1, b1=b1, w2=w2, b2=b2, w3=w3, b3=b3,
                v1=v1, c1=c1, v2=v2, c2=c2)


if __name__ == "__main__":
    key = jax.random.PRNGKey(0)
    kx, kx0, kp = jax.random.split(key, 3)

    # Small shapes consistent with Phi(z_dim=32, h_dim=32, data_dim=16).
    batch, z_dim, h_dim, data_dim = 200, 32, 32, 16  # 200 -> exercises padding + 2 grid steps
    x = jax.random.normal(kx, (batch, z_dim), dtype=jnp.float32)
    x0 = jax.random.normal(kx0, (batch, data_dim), dtype=jnp.float32)
    params = init_params(kp, z_dim, h_dim, data_dim)

    out = phi_forward(x, x0, params)
    out = jax.block_until_ready(out)

    ref = _phi_ref(x, x0, params)
    assert out.shape == (batch, h_dim), out.shape
    assert jnp.allclose(out, ref, rtol=1e-5, atol=1e-5), (
        "max abs err:", float(jnp.max(jnp.abs(out - ref))))

    print("KERNEL_OK")
</pallas_src>

<mosaic_0001>
module attributes {stable_mosaic.version = 11 : i64} {
  func.func @_phi_kernel(%arg0: i32, %arg1: memref<128x32xf32, #tpu.memory_space<vmem>>, %arg2: memref<128x16xf32, #tpu.memory_space<vmem>>, %arg3: memref<32x64xf32, #tpu.memory_space<vmem>>, %arg4: memref<1x64xf32, #tpu.memory_space<vmem>>, %arg5: memref<64x64xf32, #tpu.memory_space<vmem>>, %arg6: memref<1x64xf32, #tpu.memory_space<vmem>>, %arg7: memref<64x32xf32, #tpu.memory_space<vmem>>, %arg8: memref<1x32xf32, #tpu.memory_space<vmem>>, %arg9: memref<16x32xf32, #tpu.memory_space<vmem>>, %arg10: memref<1x32xf32, #tpu.memory_space<vmem>>, %arg11: memref<32x32xf32, #tpu.memory_space<vmem>>, %arg12: memref<1x32xf32, #tpu.memory_space<vmem>>, %arg13: memref<128x32xf32, #tpu.memory_space<vmem>>) attributes {dimension_semantics = [#tpu.dimension_semantics<parallel>], iteration_bounds = array<i64: 2>, scalar_prefetch = 0 : i64, scratch_operands = 0 : i64, tpu.core_type = #tpu.core_type<tc>, window_params = [{transform_indices = @transform_0, window_bounds = array<i64: 128, 32>}, {transform_indices = @transform_1, window_bounds = array<i64: 128, 16>}, {pipeline_mode = #tpu.pipeline_mode<synchronous>, transform_indices = @transform_2, window_bounds = array<i64: 32, 64>}, {pipeline_mode = #tpu.pipeline_mode<synchronous>, transform_indices = @transform_3, window_bounds = array<i64: 1, 64>}, {pipeline_mode = #tpu.pipeline_mode<synchronous>, transform_indices = @transform_4, window_bounds = array<i64: 64, 64>}, {pipeline_mode = #tpu.pipeline_mode<synchronous>, transform_indices = @transform_5, window_bounds = array<i64: 1, 64>}, {pipeline_mode = #tpu.pipeline_mode<synchronous>, transform_indices = @transform_6, window_bounds = array<i64: 64, 32>}, {pipeline_mode = #tpu.pipeline_mode<synchronous>, transform_indices = @transform_7, window_bounds = array<i64: 1, 32>}, {pipeline_mode = #tpu.pipeline_mode<synchronous>, transform_indices = @transform_8, window_bounds = array<i64: 16, 32>}, {pipeline_mode = #tpu.pipeline_mode<synchronous>, transform_indices = @transform_9, window_bounds = array<i64: 1, 32>}, {pipeline_mode = #tpu.pipeline_mode<synchronous>, transform_indices = @transform_10, window_bounds = array<i64: 32, 32>}, {pipeline_mode = #tpu.pipeline_mode<synchronous>, transform_indices = @transform_11, window_bounds = array<i64: 1, 32>}, {transform_indices = @transform_12, window_bounds = array<i64: 128, 32>}]} {
    %c0 = arith.constant 0 : index
    %c0_0 = arith.constant 0 : index
    %0 = vector.load %arg1[%c0, %c0_0] : memref<128x32xf32, #tpu.memory_space<vmem>>, vector<128x32xf32>
    %c0_1 = arith.constant 0 : index
    %c0_2 = arith.constant 0 : index
    %1 = vector.load %arg2[%c0_1, %c0_2] : memref<128x16xf32, #tpu.memory_space<vmem>>, vector<128x16xf32>
    %c0_3 = arith.constant 0 : index
    %c0_4 = arith.constant 0 : index
    %2 = vector.load %arg3[%c0_3, %c0_4] : memref<32x64xf32, #tpu.memory_space<vmem>>, vector<32x64xf32>
    %cst = arith.constant dense<0.000000e+00> : vector<128x64xf32>
    %3 = tpu.matmul %0, %2, %cst {dimension_numbers = #tpu.dot_dimension_numbers<[1], [0], [0], [1], [0, 0, 1, 1], [], []>} : vector<128x32xf32>, vector<32x64xf32>, vector<128x64xf32> -> vector<128x64xf32>
    %c0_5 = arith.constant 0 : index
    %c0_6 = arith.constant 0 : index
    %4 = vector.load %arg4[%c0_5, %c0_6] : memref<1x64xf32, #tpu.memory_space<vmem>>, vector<1x64xf32>
    %5 = vector.broadcast %4 : vector<1x64xf32> to vector<128x64xf32>
    %6 = arith.addf %3, %5 : vector<128x64xf32>
    %cst_7 = arith.constant 0.000000e+00 : f32
    %7 = vector.broadcast %cst_7 : f32 to vector<128x64xf32>
    %8 = arith.subf %7, %6 : vector<128x64xf32>
    %9 = math.exp %8 : vector<128x64xf32>
    %cst_8 = arith.constant 1.000000e+00 : f32
    %10 = vector.broadcast %cst_8 : f32 to vector<128x64xf32>
    %11 = arith.addf %10, %9 : vector<128x64xf32>
    %cst_9 = arith.constant 1.000000e+00 : f32
    %12 = vector.broadcast %cst_9 : f32 to vector<128x64xf32>
    %13 = arith.divf %12, %11 : vector<128x64xf32>
    %c0_10 = arith.constant 0 : index
    %c0_11 = arith.constant 0 : index
    %14 = vector.load %arg5[%c0_10, %c0_11] : memref<64x64xf32, #tpu.memory_space<vmem>>, vector<64x64xf32>
    %cst_12 = arith.constant dense<0.000000e+00> : vector<128x64xf32>
    %15 = tpu.matmul %13, %14, %cst_12 {dimension_numbers = #tpu.dot_dimension_numbers<[1], [0], [0], [1], [0, 0, 1, 1], [], []>} : vector<128x64xf32>, vector<64x64xf32>, vector<128x64xf32> -> vector<128x64xf32>
    %c0_13 = arith.constant 0 : index
    %c0_14 = arith.constant 0 : index
    %16 = vector.load %arg6[%c0_13, %c0_14] : memref<1x64xf32, #tpu.memory_space<vmem>>, vector<1x64xf32>
    %17 = vector.broadcast %16 : vector<1x64xf32> to vector<128x64xf32>
    %18 = arith.addf %15, %17 : vector<128x64xf32>
    %cst_15 = arith.constant 0.000000e+00 : f32
    %19 = vector.broadcast %cst_15 : f32 to vector<128x64xf32>
    %20 = arith.subf %19, %18 : vector<128x64xf32>
    %21 = math.exp %20 : vector<128x64xf32>
    %cst_16 = arith.constant 1.000000e+00 : f32
    %22 = vector.broadcast %cst_16 : f32 to vector<128x64xf32>
    %23 = arith.addf %22, %21 : vector<128x64xf32>
    %cst_17 = arith.constant 1.000000e+00 : f32
    %24 = vector.broadcast %cst_17 : f32 to vector<128x64xf32>
    %25 = arith.divf %24, %23 : vector<128x64xf32>
    %c0_18 = arith.constant 0 : index
    %c0_19 = arith.constant 0 : index
    %26 = vector.load %arg7[%c0_18, %c0_19] : memref<64x32xf32, #tpu.memory_space<vmem>>, vector<64x32xf32>
    %cst_20 = arith.constant dense<0.000000e+00> : vector<128x32xf32>
    %27 = tpu.matmul %25, %26, %cst_20 {dimension_numbers = #tpu.dot_dimension_numbers<[1], [0], [0], [1], [0, 0, 1, 1], [], []>} : vector<128x64xf32>, vector<64x32xf32>, vector<128x32xf32> -> vector<128x32xf32>
    %c0_21 = arith.constant 0 : index
    %c0_22 = arith.constant 0 : index
    %28 = vector.load %arg8[%c0_21, %c0_22] : memref<1x32xf32, #tpu.memory_space<vmem>>, vector<1x32xf32>
    %29 = vector.broadcast %28 : vector<1x32xf32> to vector<128x32xf32>
    %30 = arith.addf %27, %29 : vector<128x32xf32>
    %c0_23 = arith.constant 0 : index
    %c0_24 = arith.constant 0 : index
    %31 = vector.load %arg9[%c0_23, %c0_24] : memref<16x32xf32, #tpu.memory_space<vmem>>, vector<16x32xf32>
    %cst_25 = arith.constant dense<0.000000e+00> : vector<128x32xf32>
    %32 = tpu.matmul %1, %31, %cst_25 {dimension_numbers = #tpu.dot_dimension_numbers<[1], [0], [0], [1], [0, 0, 1, 1], [], []>} : vector<128x16xf32>, vector<16x32xf32>, vector<128x32xf32> -> vector<128x32xf32>
    %c0_26 = arith.constant 0 : index
    %c0_27 = arith.constant 0 : index
    %33 = vector.load %arg10[%c0_26, %c0_27] : memref<1x32xf32, #tpu.memory_space<vmem>>, vector<1x32xf32>
    %34 = vector.broadcast %33 : vector<1x32xf32> to vector<128x32xf32>
    %35 = arith.addf %32, %34 : vector<128x32xf32>
    %cst_28 = arith.constant 0.000000e+00 : f32
    %36 = vector.broadcast %cst_28 : f32 to vector<128x32xf32>
    %37 = arith.subf %36, %35 : vector<128x32xf32>
    %38 = math.exp %37 : vector<128x32xf32>
    %cst_29 = arith.constant 1.000000e+00 : f32
    %39 = vector.broadcast %cst_29 : f32 to vector<128x32xf32>
    %40 = arith.addf %39, %38 : vector<128x32xf32>
    %cst_30 = arith.constant 1.000000e+00 : f32
    %41 = vector.broadcast %cst_30 : f32 to vector<128x32xf32>
    %42 = arith.divf %41, %40 : vector<128x32xf32>
    %c0_31 = arith.constant 0 : index
    %c0_32 = arith.constant 0 : index
    %43 = vector.load %arg11[%c0_31, %c0_32] : memref<32x32xf32, #tpu.memory_space<vmem>>, vector<32x32xf32>
    %cst_33 = arith.constant dense<0.000000e+00> : vector<128x32xf32>
    %44 = tpu.matmul %42, %43, %cst_33 {dimension_numbers = #tpu.dot_dimension_numbers<[1], [0], [0], [1], [0, 0, 1, 1], [], []>} : vector<128x32xf32>, vector<32x32xf32>, vector<128x32xf32> -> vector<128x32xf32>
    %c0_34 = arith.constant 0 : index
    %c0_35 = arith.constant 0 : index
    %45 = vector.load %arg12[%c0_34, %c0_35] : memref<1x32xf32, #tpu.memory_space<vmem>>, vector<1x32xf32>
    %46 = vector.broadcast %45 : vector<1x32xf32> to vector<128x32xf32>
    %47 = arith.addf %44, %46 : vector<128x32xf32>
    %48 = arith.addf %30, %47 : vector<128x32xf32>
    %c0_36 = arith.constant 0 : index
    %c0_37 = arith.constant 0 : index
    %49 = vector.load %arg13[%c0_36, %c0_37] : memref<128x32xf32, #tpu.memory_space<vmem>>, vector<128x32xf32>
    tpu.vector_store %arg13[%c0_36, %c0_37], %48 {strides = array<i32>} : memref<128x32xf32, #tpu.memory_space<vmem>>, vector<128x32xf32>,
    return
  }
  func.func @transform_0(%arg0: i32) -> (i32, i32) {
    %c0_i32 = arith.constant 0 : i32
    %c0_i32_0 = arith.constant 0 : i32
    return %arg0, %c0_i32 : i32, i32
  }
  func.func @transform_1(%arg0: i32) -> (i32, i32) {
    %c0_i32 = arith.constant 0 : i32
    %c0_i32_0 = arith.constant 0 : i32
    return %arg0, %c0_i32 : i32, i32
  }
  func.func @transform_2(%arg0: i32) -> (i32, i32) {
    %c0_i32 = arith.constant 0 : i32
    %c0_i32_0 = arith.constant 0 : i32
    %c0_i32_1 = arith.constant 0 : i32
    return %c0_i32, %c0_i32_0 : i32, i32
  }
  func.func @transform_3(%arg0: i32) -> (i32, i32) {
    %c0_i32 = arith.constant 0 : i32
    %c0_i32_0 = arith.constant 0 : i32
    %c0_i32_1 = arith.constant 0 : i32
    return %c0_i32, %c0_i32_0 : i32, i32
  }
  func.func @transform_4(%arg0: i32) -> (i32, i32) {
    %c0_i32 = arith.constant 0 : i32
    %c0_i32_0 = arith.constant 0 : i32
    %c0_i32_1 = arith.constant 0 : i32
    return %c0_i32, %c0_i32_0 : i32, i32
  }
  func.func @transform_5(%arg0: i32) -> (i32, i32) {
    %c0_i32 = arith.constant 0 : i32
    %c0_i32_0 = arith.constant 0 : i32
    %c0_i32_1 = arith.constant 0 : i32
    return %c0_i32, %c0_i32_0 : i32, i32
  }
  func.func @transform_6(%arg0: i32) -> (i32, i32) {
    %c0_i32 = arith.constant 0 : i32
    %c0_i32_0 = arith.constant 0 : i32
    %c0_i32_1 = arith.constant 0 : i32
    return %c0_i32, %c0_i32_0 : i32, i32
  }
  func.func @transform_7(%arg0: i32) -> (i32, i32) {
    %c0_i32 = arith.constant 0 : i32
    %c0_i32_0 = arith.constant 0 : i32
    %c0_i32_1 = arith.constant 0 : i32
    return %c0_i32, %c0_i32_0 : i32, i32
  }
  func.func @transform_8(%arg0: i32) -> (i32, i32) {
    %c0_i32 = arith.constant 0 : i32
    %c0_i32_0 = arith.constant 0 : i32
    %c0_i32_1 = arith.constant 0 : i32
    return %c0_i32, %c0_i32_0 : i32, i32
  }
  func.func @transform_9(%arg0: i32) -> (i32, i32) {
    %c0_i32 = arith.constant 0 : i32
    %c0_i32_0 = arith.constant 0 : i32
    %c0_i32_1 = arith.constant 0 : i32
    return %c0_i32, %c0_i32_0 : i32, i32
  }
  func.func @transform_10(%arg0: i32) -> (i32, i32) {
    %c0_i32 = arith.constant 0 : i32
    %c0_i32_0 = arith.constant 0 : i32
    %c0_i32_1 = arith.constant 0 : i32
    return %c0_i32, %c0_i32_0 : i32, i32
  }
  func.func @transform_11(%arg0: i32) -> (i32, i32) {
    %c0_i32 = arith.constant 0 : i32
    %c0_i32_0 = arith.constant 0 : i32
    %c0_i32_1 = arith.constant 0 : i32
    return %c0_i32, %c0_i32_0 : i32, i32
  }
  func.func @transform_12(%arg0: i32) -> (i32, i32) {
    %c0_i32 = arith.constant 0 : i32
    %c0_i32_0 = arith.constant 0 : i32
    return %arg0, %c0_i32 : i32, i32
  }
}

</mosaic_0001>

<bundles_post_ra>
// kernel: tpu_custom_call.1
= control target key start
LH: loop header
LB: loop body
LE: loop exit
PB: predicated region body
PF: predicated region fallthrough
CT: control target
= control target key end

     0   :  { %s2482_s21 = smov 0   ;;  %s3355_s0 = inlined_call_operand.vmem [shape: f32[256,32], index: 0, kind: input, shape index: {}]   ;;  %s3356_s1 = inlined_call_operand.vmem [shape: f32[256,16], index: 1, kind: input, shape index: {}]   ;;  %s3357_s2 = inlined_call_operand.vmem [shape: f32[32,64], index: 2, kind: input, shape index: {}]   ;;  %s3358_s3 = inlined_call_operand.vmem [shape: f32[1,64], index: 3, kind: input, shape index: {}]   ;;  %s3359_s4 = inlined_call_operand.vmem [shape: f32[64,64], index: 4, kind: input, shape index: {}]   ;;  %s3360_s5 = inlined_call_operand.vmem [shape: f32[1,64], index: 5, kind: input, shape index: {}]   ;;  %s3361_s6 = inlined_call_operand.vmem [shape: f32[64,32], index: 6, kind: input, shape index: {}]   ;;  %s3362_s7 = inlined_call_operand.vmem [shape: f32[1,32], index: 7, kind: input, shape index: {}]   ;;  %s3363_s8 = inlined_call_operand.vmem [shape: f32[16,32], index: 8, kind: input, shape index: {}]   ;;  %s3364_s9 = inlined_call_operand.vmem [shape: f32[1,32], index: 9, kind: input, shape index: {}]   ;;  %s3365_s10 = inlined_call_operand.vmem [shape: f32[32,32], index: 10, kind: input, shape index: {}]   ;;  %s3366_s11 = inlined_call_operand.vmem [shape: f32[1,32], index: 11, kind: input, shape index: {}]   ;;  %s3367_s12 = inlined_call_operand.vmem [shape: f32[256,32], index: 12, kind: output, shape index: {}]  }
   0x1 LB: > { %s2097_s22 = sadd.s32 4294967295, %s2415_s21   ;;  %p2101_p0 = scmp.ge.s32.totalorder %s2415_s21, 1  ;;  %s2415_s21 = sphi %s2482_s21, %s22_s21  }
   0x2   : > { %p374_p1 = scmp.lt.s32.totalorder %s2415_s21, 3 }
   0x4   : > { %p375_p2 = pnand %p2101_p0, %p374_p1 }
   0x5   : > { %s2102_s27 = sshll.u32 (!%p375_p2), %s2097_s22, 4 }
   0x6   : > { %378 = sbr.rel (%p375_p2) target bundleno = 640 (0x280), region = 68  ;;  %p422_p3 = scmp.lt.s32.totalorder (!%p375_p2), %s2102_s27, 31 }
   0xb   : > { %v474_v0 = vld [vmem:[%s3357_s2 + $0x18] sm:$0xff]  ;;  %v473_v1 = vld [vmem:[%s3357_s2 + $0x10] sm:$0xff]  ;;  %v472_v2 = vld [vmem:[%s3357_s2 + $0x8] sm:$0xff]  ;;  %s3409_s27 = smov (!%p422_p3, %s2102_s27), 31  ;;  %vm479_vm0 = vcmask 261120   ;;  %vm1458_vm1 = vcmask 130048  }
   0xc   : > { %540 = vmatpush.msra.mxu0 %v474_v0  ;;  %2190 = vmatpush.msra.mxu1 %v474_v0  ;;  %v471_v3 = vld [vmem:[%s3357_s2] sm:$0xff]  ;;  %s2502_s14 = sshll.u32 %s3409_s27, 3  ;;  %v1453_v20 = vld [vmem:[%s3363_s8 + $0x8] sm:$0xff]  ;;  %v904_v21 = vld [vmem:[%s3359_s4 + $0x38] sm:$0xff]  ;;  %vm909_vm5 = vcmask 523264  }
   0xd   : > { %2191 = vmatpush.msra.mxu2 %v474_v0  ;;  %s2508_s17 = scalar_lea.vmem %s3355_s0, %s2502_s14  ;;  %2199 = vmatpush.msra.mxu3 %v1453_v20  ;;  %v903_v22 = vld [vmem:[%s3359_s4 + $0x30] sm:$0xff]  ;;  %v902_v23 = vld [vmem:[%s3359_s4 + $0x28] sm:$0xff]  ;;  %v901_v24 = vld [vmem:[%s3359_s4 + $0x20] sm:$0xff]  ;;  %s2575_s23 = scalar_lea.vmem %s3356_s1, %s2502_s14 }
   0xe   : > { %541 = vmatpush.msra.mxu0 %v473_v1  ;;  %2192 = vmatpush.msra.mxu1 %v473_v1  ;;  %v439_v4 = vld [vmem:[%s2508_s17] sm:$0xff]  ;;  %v440_v5 = vld [vmem:[%s2508_s17 + $0x8] sm:$0xff]  ;;  %v441_v6 = vld [vmem:[%s2508_s17 + $0x10] sm:$0xff]  ;;  %s3259_s18 = scalar_lea.vmem %s3367_s12, %s2502_s14 }
   0xf   : > { %2193 = vmatpush.msra.mxu2 %v473_v1  ;;  %v442_v7 = vld [vmem:[%s2508_s17 + $0x18] sm:$0xff]  ;;  %v443_v8 = vld [vmem:[%s2508_s17 + $0x20] sm:$0xff]  ;;  %v449_v9 = vld [vmem:[%s2508_s17 + $0x50] sm:$0xff] }
  0x10   : > { %542 = vmatpush.msra.mxu0 %v472_v2  ;;  %2194 = vmatpush.msra.mxu1 %v472_v2  ;;  %v444_v10 = vld [vmem:[%s2508_s17 + $0x28] sm:$0xff]  ;;  %v450_v11 = vld [vmem:[%s2508_s17 + $0x58] sm:$0xff]  ;;  %v451_v12 = vld [vmem:[%s2508_s17 + $0x60] sm:$0xff] }
  0x11   : > { %2195 = vmatpush.msra.mxu2 %v472_v2  ;;  %v445_v13 = vld [vmem:[%s2508_s17 + $0x30] sm:$0xff]  ;;  %v452_v14 = vld [vmem:[%s2508_s17 + $0x68] sm:$0xff]  ;;  %v446_v15 = vld [vmem:[%s2508_s17 + $0x38] sm:$0xff] }
  0x12   : > { %543 = vmatpush.msra.mxu0 %v471_v3  ;;  %2196 = vmatpush.msra.mxu1 %v471_v3  ;;  %v453_v16 = vld [vmem:[%s2508_s17 + $0x70] sm:$0xff]  ;;  %v447_v17 = vld [vmem:[%s2508_s17 + $0x40] sm:$0xff]  ;;  %v454_v18 = vld [vmem:[%s2508_s17 + $0x78] sm:$0xff] }
  0x13   : > { %2108 = vmatmul.msk.f32.vlgmr.msra.gmra.mxu0 %vm479_vm0, %v439_v4  ;;  %2197 = vmatpush.msra.mxu2 %v471_v3  ;;  %v448_v19 = vld [vmem:[%s2508_s17 + $0x48] sm:$0xff]  ;;  %v900_v25 = vld [vmem:[%s3359_s4 + $0x18] sm:$0xff]  ;;  %v899_v26 = vld [vmem:[%s3359_s4 + $0x10] sm:$0xff] }
  0x14   : > { %2118 = vmatmul.msk.f32.vlgmr.msra.gmra.mxu1 %vm479_vm0, %v449_v9  ;;  %2120 = vmatmul.msk.f32.vlgmr.msra.gmra.mxu2 %vm479_vm0, %v451_v12  ;;  %v2566_v27 = vld [vmem:[%s3358_s3] ss:$0 sm:$0xff]  ;;  %v898_v28 = vld [vmem:[%s3359_s4 + $0x8] sm:$0xff]  ;;  %v457_v45 = vld [vmem:[%s2575_s23 + $0x10] sm:$0xff] }
  0x15   : > { %1521 = vmatpush.msrb.mxu0 %v1453_v20  ;;  %966 = vmatpush.msrb.mxu1 %v904_v21  ;;  %v897_v29 = vld [vmem:[%s3359_s4] sm:$0xff]  ;;  %v456_v37 = vld [vmem:[%s2575_s23 + $0x8] sm:$0xff]  ;;  %v458_v55 = vld [vmem:[%s2575_s23 + $0x18] sm:$0xff] }
  0x16   : > { %v1452_v30 = vld [vmem:[%s3363_s8] sm:$0xff] }
  0x17   : > { %967 = vmatpush.msrb.mxu1 %v903_v22  ;;  %1522 = vmatpush.msrb.mxu0 %v1452_v30  ;;  %v455_v32 = vld [vmem:[%s2575_s23] sm:$0xff] }
  0x18   : > { %2201 = vmatpush.msra.mxu3 %v1452_v30 }
  0x19   : > { %968 = vmatpush.msrb.mxu1 %v902_v23 }
  0x1b   : > { %2109 = vmatmul.msk.f32.gmra.mxu0 %vm479_vm0, %v440_v5  ;;  %969 = vmatpush.msrb.mxu1 %v901_v24 }
  0x1c   : > { %2119 = vmatmul.msk.f32.gmra.mxu1 %vm479_vm0, %v450_v11  ;;  %2121 = vmatmul.msk.f32.gmra.mxu2 %vm479_vm0, %v452_v14 }
  0x1d   : > { %970 = vmatpush.msrb.mxu1 %v900_v25  ;;  %v460_v25 = vld [vmem:[%s2575_s23 + $0x28] sm:$0xff] }
  0x1f   : > { %971 = vmatpush.msrb.mxu1 %v899_v26 }
  0x21   : > { %972 = vmatpush.msrb.mxu1 %v898_v28 }
  0x23   : > { %2110 = vmatmul.msk.f32.gmra.mxu0 %vm479_vm0, %v441_v6  ;;  %973 = vmatpush.msrb.mxu1 %v897_v29 }
  0x24   : > { %2122 = vmatmul.msk.f32.gmra.mxu2 %vm479_vm0, %v453_v16 }
  0x25   : > { %2198 = vmatpush.msra.mxu1 %v1453_v20 }
  0x27   : > { %2200 = vmatpush.msra.mxu1 %v1452_v30 }
  0x2b   : > { %2111 = vmatmul.msk.f32.gmra.mxu0 %vm479_vm0, %v442_v7 }
  0x2c   : > { %2123 = vmatmul.msk.f32.gmra.mxu2 %vm479_vm0, %v454_v18 }
  0x33   : > { %2112 = vmatmul.msk.f32.gmra.mxu0 %vm479_vm0, %v443_v8  ;;  %v459_v8 = vld [vmem:[%s2575_s23 + $0x20] sm:$0xff] }
  0x3b   : > { %2113 = vmatmul.msk.f32.gmra.mxu0 %vm479_vm0, %v444_v10 }
  0x43   : > { %2114 = vmatmul.msk.f32.gmra.mxu0 %vm479_vm0, %v445_v13 }
  0x4b   : > { %2115 = vmatmul.msk.f32.gmra.mxu0 %vm479_vm0, %v446_v15 }
  0x53   : > { %2116 = vmatmul.msk.f32.gmra.mxu0 %vm479_vm0, %v447_v17 }
  0x5b   : > { %2117 = vmatmul.msk.f32.gmra.mxu0 %vm479_vm0, %v448_v19 }
  0x63   : > { %2156 = vmatmul.msk.f32.vlgmr.msrb.gmra.mxu0 %vm1458_vm1, %v455_v32 }
  0x6b   : > { %2157 = vmatmul.msk.f32.gmra.mxu0 %vm1458_vm1, %v456_v37 }
  0x73   : > { %2158 = vmatmul.msk.f32.gmra.mxu0 %vm1458_vm1, %v457_v45 }
  0x7b   : > { %2159 = vmatmul.msk.f32.gmra.mxu0 %vm1458_vm1, %v458_v55 }
  0x83   : > { %2160 = vmatmul.msk.f32.gmra.mxu0 %vm1458_vm1, %v459_v8 }
  0x8b   : > { %2161 = vmatmul.msk.f32.gmra.mxu0 %vm1458_vm1, %v460_v25 }
  0x90   : > { %v545_v31 = vpop.f32.mrf.mxu0 }
  0x91   : > { %v546_v33 = vadd.f32 %v2566_v27, %v545_v31 }
  0x93   : > { %v593_v34 = vsub.f32 0.0, %v546_v33 }
  0x95   : > { %v609_v35 = vmul.f32 1.442695, %v593_v34 }
  0x97   : > { %2215 = vpow2.f32 %v609_v35 }
  0x98   : > { %v548_v36 = vpop.f32.mrf.mxu0 }
  0x99   : > { %v549_v38 = vadd.f32 %v2566_v27, %v548_v36 }
  0x9b   : > { %v594_v39 = vsub.f32 0.0, %v549_v38 }
  0x9d   : > { %v2216_v40 = vpop.eup %2215  ;;  %v611_v41 = vmul.f32 1.442695, %v594_v39 }
  0x9e   : > { %v641_v42 = vadd.f32 1.0, %v2216_v40 }
  0x9f   : > { %2217 = vpow2.f32 %v611_v41 }
  0xa0   : > { %2219 = vrcp.f32 %v641_v42  ;;  %v551_v43 = vpop.f32.mrf.mxu0  ;;  %v668_v56 = vand.u32 2147483648, %v641_v42  ;;  %v666_v59 = vand.u32 2147483647, %v641_v42  ;;  %vm662_vm3 = vweird.f32 %v641_v42 }
  0xa1   : > { %v552_v44 = vadd.f32 %v2566_v27, %v551_v43  ;;  %v461_v43 = vld [vmem:[%s2575_s23 + $0x30] sm:$0xff] }
  0xa2   : > { %v669_v1 = vor.u32 1.1754944e-38, %v668_v56  ;;  %vm667_vm6 = vcmp.eq.f32.partialorder %v666_v59, 8.507059e+37  ;;  %2162 = vmatmul.msk.f32.gmra.mxu0 %vm1458_vm1, %v461_v43 }
  0xa3   : > { %v595_v46 = vsub.f32 0.0, %v552_v44 }
  0xa5   : > { %v2218_v47 = vpop.eup %2217  ;;  %v613_v48 = vmul.f32 1.442695, %v595_v46 }
  0xa6   : > { %v2220_v49 = vpop.eup %2219  ;;  %v642_v50 = vadd.f32 1.0, %v2218_v47 }
  0xa7   : > { %2221 = vpow2.f32 %v613_v48  ;;  %v658_v51 = vmul.f32 %v2220_v49, %v641_v42  ;;  %vm663_vm2 = vweird.f32 %v2220_v49 }
  0xa8   : > { %2223 = vrcp.f32 %v642_v50  ;;  %v554_v52 = vpop.f32.mrf.mxu0  ;;  %vm664_vm4 = vmor %vm662_vm3, %vm663_vm2  ;;  %v683_v9 = vand.u32 2147483648, %v642_v50  ;;  %v681_v12 = vand.u32 2147483647, %v642_v50  ;;  %vm677_vm8 = vweird.f32 %v642_v50 }
  0xa9   : > { %v555_v53 = vadd.f32 %v2566_v27, %v554_v52  ;;  %v659_v54 = vsub.f32 1.0, %v658_v51  ;;  %v575_v51 = vpop.f32.mrf.mxu1 }
  0xaa   : > { %v684_v18 = vor.u32 1.1754944e-38, %v683_v9  ;;  %vm682_vm10 = vcmp.eq.f32.partialorder %v681_v12, 8.507059e+37 }
  0xab   : > { %v596_v57 = vsub.f32 0.0, %v555_v53  ;;  %v660_v58 = vmul.f32 %v2220_v49, %v659_v54 }
  0xad   : > { %v2222_v60 = vpop.eup %2221  ;;  %v615_v61 = vmul.f32 1.442695, %v596_v57  ;;  %v661_v62 = vadd.f32 %v2220_v49, %v660_v58 }
  0xae   : > { %v2224_v63 = vpop.eup %2223  ;;  %v643_v0 = vadd.f32 1.0, %v2222_v60 }
  0xaf   : > { %2225 = vpow2.f32 %v615_v61  ;;  %v665_v2 = vsel %vm664_vm4, %v2220_v49, %v661_v62  ;;  %v673_v3 = vmul.f32 %v2224_v63, %v642_v50  ;;  %vm678_vm7 = vweird.f32 %v2224_v63  ;;  %v462_v61 = vld [vmem:[%s2575_s23 + $0x38] sm:$0xff] }
  0xb0   : > { %2227 = vrcp.f32 %v643_v0  ;;  %v557_v4 = vpop.f32.mrf.mxu0  ;;  %v670_v5 = vsel %vm667_vm6, %v669_v1, %v665_v2  ;;  %vm679_vm9 = vmor %vm677_vm8, %vm678_vm7  ;;  %v698_v26 = vand.u32 2147483648, %v643_v0  ;;  %v696_v30 = vand.u32 2147483647, %v643_v0  ;;  %2163 = vmatmul.msk.f32.gmra.mxu0 %vm1458_vm1, %v462_v61 }
  0xb1   : > { %v558_v6 = vadd.f32 %v2566_v27, %v557_v4  ;;  %2124 = vmatmul.msk.f32.vlgmr.msrb.gmra.mxu1 %vm909_vm5, %v670_v5  ;;  %v674_v7 = vsub.f32 1.0, %v673_v3  ;;  %vm692_vm12 = vweird.f32 %v643_v0  ;;  %v578_v12 = vpop.f32.mrf.mxu1 }
  0xb2   : > { %v699_v36 = vor.u32 1.1754944e-38, %v698_v26  ;;  %vm697_vm14 = vcmp.eq.f32.partialorder %v696_v30, 8.507059e+37 }
  0xb3   : > { %v597_v10 = vsub.f32 0.0, %v558_v6  ;;  %v675_v11 = vmul.f32 %v2224_v63, %v674_v7 }
  0xb5   : > { %v2226_v13 = vpop.eup %2225  ;;  %v617_v14 = vmul.f32 1.442695, %v597_v10  ;;  %v676_v15 = vadd.f32 %v2224_v63, %v675_v11 }
  0xb6   : > { %v2228_v16 = vpop.eup %2227  ;;  %v644_v17 = vadd.f32 1.0, %v2226_v13 }
  0xb7   : > { %2229 = vpow2.f32 %v617_v14  ;;  %v680_v19 = vsel %vm679_vm9, %v2224_v63, %v676_v15  ;;  %v688_v20 = vmul.f32 %v2228_v16, %v643_v0  ;;  %vm693_vm11 = vweird.f32 %v2228_v16 }
  0xb8   : > { %2231 = vrcp.f32 %v644_v17  ;;  %v560_v21 = vpop.f32.mrf.mxu0  ;;  %v685_v22 = vsel %vm682_vm10, %v684_v18, %v680_v19  ;;  %vm694_vm13 = vmor %vm692_vm12, %vm693_vm11  ;;  %v713_v44 = vand.u32 2147483648, %v644_v17  ;;  %v711_v47 = vand.u32 2147483647, %v644_v17 }
  0xb9   : > { %v561_v23 = vadd.f32 %v2566_v27, %v560_v21  ;;  %2125 = vmatmul.msk.f32.gmra.mxu1 %vm909_vm5, %v685_v22  ;;  %v689_v24 = vsub.f32 1.0, %v688_v20  ;;  %vm707_vm2 = vweird.f32 %v644_v17  ;;  %v576_v63 = vadd.f32 %v2566_v27, %v575_v51  ;;  %v581_v21 = vpop.f32.mrf.mxu2 }
  0xba   : > { %v714_v54 = vor.u32 1.1754944e-38, %v713_v44  ;;  %vm712_vm4 = vcmp.eq.f32.partialorder %v711_v47, 8.507059e+37  ;;  %v579_v20 = vadd.f32 %v2566_v27, %v578_v12 }
  0xbb   : > { %v598_v28 = vsub.f32 0.0, %v561_v23  ;;  %v690_v29 = vmul.f32 %v2228_v16, %v689_v24  ;;  %v603_v9 = vsub.f32 0.0, %v576_v63 }
  0xbd   : > { %v2230_v31 = vpop.eup %2229  ;;  %v619_v32 = vmul.f32 1.442695, %v598_v28  ;;  %v691_v33 = vadd.f32 %v2228_v16, %v690_v29  ;;  %v629_v18 = vmul.f32 1.442695, %v603_v9 }
  0xbe   : > { %v2232_v34 = vpop.eup %2231  ;;  %v645_v35 = vadd.f32 1.0, %v2230_v31 }
  0xbf   : > { %2233 = vpow2.f32 %v619_v32  ;;  %v695_v37 = vsel %vm694_vm13, %v2228_v16, %v691_v33  ;;  %v703_v38 = vmul.f32 %v2232_v34, %v644_v17  ;;  %vm708_vm15 = vweird.f32 %v2232_v34  ;;  %v463_v17 = vld [vmem:[%s2575_s23 + $0x40] sm:$0xff] }
  0xc0   : > { %2235 = vrcp.f32 %v645_v35  ;;  %v563_v39 = vpop.f32.mrf.mxu0  ;;  %v700_v40 = vsel %vm697_vm14, %v699_v36, %v695_v37  ;;  %vm709_vm3 = vmor %vm707_vm2, %vm708_vm15  ;;  %v728_v62 = vand.u32 2147483648, %v645_v35  ;;  %v726_v2 = vand.u32 2147483647, %v645_v35  ;;  %2164 = vmatmul.msk.f32.gmra.mxu0 %vm1458_vm1, %v463_v17 }
  0xc1   : > { %v564_v41 = vadd.f32 %v2566_v27, %v563_v39  ;;  %2126 = vmatmul.msk.f32.gmra.mxu1 %vm909_vm5, %v700_v40  ;;  %v704_v42 = vsub.f32 1.0, %v703_v38  ;;  %vm722_vm7 = vweird.f32 %v645_v35  ;;  %v604_v32 = vsub.f32 0.0, %v579_v20  ;;  %v464_v39 = vld [vmem:[%s2575_s23 + $0x48] sm:$0xff]  ;;  %v584_v47 = vpop.f32.mrf.mxu2 }
  0xc2   : > { %v729_v8 = vor.u32 1.1754944e-38, %v728_v62  ;;  %vm727_vm9 = vcmp.eq.f32.partialorder %v726_v2, 8.507059e+37 }
  0xc3   : > { %v599_v45 = vsub.f32 0.0, %v564_v41  ;;  %v705_v46 = vmul.f32 %v2232_v34, %v704_v42  ;;  %v631_v40 = vmul.f32 1.442695, %v604_v32  ;;  %v582_v42 = vadd.f32 %v2566_v27, %v581_v21 }
  0xc5   : > { %v2234_v48 = vpop.eup %2233  ;;  %v621_v49 = vmul.f32 1.442695, %v599_v45  ;;  %v706_v50 = vadd.f32 %v2232_v34, %v705_v46 }
  0xc6   : > { %v2236_v52 = vpop.eup %2235  ;;  %v2607_v53 = vadd.f32 1.0, %v2234_v48 }
  0xc7   : > { %2237 = vpow2.f32 %v621_v49  ;;  %v710_v55 = vsel %vm709_vm3, %v2232_v34, %v706_v50  ;;  %v718_v56 = vmul.f32 %v2236_v52, %v645_v35  ;;  %vm723_vm6 = vweird.f32 %v2236_v52 }
  0xc8   : > { %2239 = vrcp.f32 %v2607_v53  ;;  %v566_v57 = vpop.f32.mrf.mxu0  ;;  %v715_v58 = vsel %vm712_vm4, %v714_v54, %v710_v55  ;;  %vm724_vm8 = vmor %vm722_vm7, %vm723_vm6  ;;  %v743_v19 = vand.u32 2147483648, %v2607_v53  ;;  %v741_v24 = vand.u32 2147483647, %v2607_v53  ;;  %2165 = vmatmul.msk.f32.gmra.mxu0 %vm1458_vm1, %v464_v39 }
  0xc9   : > { %v567_v59 = vadd.f32 %v2566_v27, %v566_v57  ;;  %2127 = vmatmul.msk.f32.gmra.mxu1 %vm909_vm5, %v715_v58  ;;  %v719_v60 = vsub.f32 1.0, %v718_v56  ;;  %vm737_vm11 = vweird.f32 %v2607_v53  ;;  %v605_v54 = vsub.f32 0.0, %v582_v42 }
  0xca   : > { %v744_v31 = vor.u32 1.1754944e-38, %v743_v19  ;;  %vm742_vm13 = vcmp.eq.f32.partialorder %v741_v24, 8.507059e+37 }
  0xcb   : > { %v600_v0 = vsub.f32 0.0, %v567_v59  ;;  %v720_v1 = vmul.f32 %v2236_v52, %v719_v60  ;;  %v633_v60 = vmul.f32 1.442695, %v605_v54 }
  0xcd   : > { %v2238_v3 = vpop.eup %2237  ;;  %v623_v4 = vmul.f32 1.442695, %v600_v0  ;;  %v721_v5 = vadd.f32 %v2236_v52, %v720_v1  ;;  %v585_v0 = vadd.f32 %v2566_v27, %v584_v47 }
  0xce   : > { %v2240_v6 = vpop.eup %2239  ;;  %v2615_v7 = vadd.f32 1.0, %v2238_v3 }
  0xcf   : > { %2241 = vpow2.f32 %v623_v4  ;;  %v725_v10 = vsel %vm724_vm8, %v2236_v52, %v721_v5  ;;  %v733_v11 = vmul.f32 %v2240_v6, %v2607_v53  ;;  %vm738_vm10 = vweird.f32 %v2240_v6 }
  0xd0   : > { %2243 = vrcp.f32 %v2615_v7  ;;  %v569_v13 = vpop.f32.mrf.mxu0  ;;  %v730_v14 = vsel %vm727_vm9, %v729_v8, %v725_v10  ;;  %vm739_vm12 = vmor %vm737_vm11, %vm738_vm10  ;;  %v758_v41 = vand.u32 2147483648, %v2615_v7  ;;  %v756_v45 = vand.u32 2147483647, %v2615_v7 }
  0xd1   : > { %v570_v15 = vadd.f32 %v2566_v27, %v569_v13  ;;  %2128 = vmatmul.msk.f32.gmra.mxu1 %vm909_vm5, %v730_v14  ;;  %v734_v16 = vsub.f32 1.0, %v733_v11  ;;  %2245 = vpow2.f32 %v629_v18  ;;  %vm752_vm15 = vweird.f32 %v2615_v7 }
  0xd2   : > { %v759_v53 = vor.u32 1.1754944e-38, %v758_v41  ;;  %vm757_vm3 = vcmp.eq.f32.partialorder %v756_v45, 8.507059e+37  ;;  %v606_v9 = vsub.f32 0.0, %v585_v0 }
  0xd3   : > { %v601_v22 = vsub.f32 0.0, %v570_v15  ;;  %v735_v23 = vmul.f32 %v2240_v6, %v734_v16 }
  0xd4   : > { %v635_v17 = vmul.f32 1.442695, %v606_v9 }
  0xd5   : > { %v2242_v25 = vpop.eup %2241  ;;  %v625_v26 = vmul.f32 1.442695, %v601_v22  ;;  %v736_v28 = vadd.f32 %v2240_v6, %v735_v23 }
  0xd6   : > { %v2244_v29 = vpop.eup %2243  ;;  %v2627_v30 = vadd.f32 1.0, %v2242_v25 }
  0xd7   : > { %2247 = vpow2.f32 %v625_v26  ;;  %v740_v33 = vsel %vm739_vm12, %v2240_v6, %v736_v28  ;;  %v748_v34 = vmul.f32 %v2244_v29, %v2615_v7  ;;  %vm753_vm14 = vweird.f32 %v2244_v29  ;;  %v2246_v46 = vpop.eup %2245  ;;  %v587_v7 = vpop.f32.mrf.mxu2 }
  0xd8   : > { %2249 = vrcp.f32 %v2627_v30  ;;  %v572_v35 = vpop.f32.mrf.mxu0  ;;  %v745_v36 = vsel %vm742_vm13, %v744_v31, %v740_v33  ;;  %vm754_vm2 = vmor %vm752_vm15, %vm753_vm14  ;;  %v2640_v57 = vadd.f32 1.0, %v2246_v46  ;;  %v773_v61 = vand.u32 2147483648, %v2627_v30 }
  0xd9   : > { %v573_v37 = vadd.f32 %v2566_v27, %v572_v35  ;;  %2129 = vmatmul.msk.f32.gmra.mxu1 %vm909_vm5, %v745_v36  ;;  %v749_v38 = vsub.f32 1.0, %v748_v34  ;;  %2251 = vpow2.f32 %v631_v40  ;;  %v771_v63 = vand.u32 2147483647, %v2627_v30 }
  0xda   : > { %vm767_vm6 = vweird.f32 %v2627_v30  ;;  %v774_v6 = vor.u32 1.1754944e-38, %v773_v61  ;;  %v588_v16 = vadd.f32 %v2566_v27, %v587_v7 }
  0xdb   : > { %v602_v43 = vsub.f32 0.0, %v573_v37  ;;  %v750_v44 = vmul.f32 %v2244_v29, %v749_v38  ;;  %vm772_vm8 = vcmp.eq.f32.partialorder %v771_v63, 8.507059e+37 }
  0xdc   : > { %v607_v25 = vsub.f32 0.0, %v588_v16 }
  0xdd   : > { %v2248_v48 = vpop.eup %2247  ;;  %v627_v49 = vmul.f32 1.442695, %v602_v43  ;;  %v751_v50 = vadd.f32 %v2244_v29, %v750_v44 }
  0xde   : > { %v2250_v51 = vpop.eup %2249  ;;  %v649_v52 = vadd.f32 1.0, %v2248_v48  ;;  %v637_v35 = vmul.f32 1.442695, %v607_v25  ;;  %v818_v48 = vand.u32 2147483648, %v2640_v57 }
  0xdf   : > { %2253 = vpow2.f32 %v627_v49  ;;  %v755_v55 = vsel %vm754_vm2, %v2244_v29, %v751_v50  ;;  %v763_v56 = vmul.f32 %v2250_v51, %v2627_v30  ;;  %vm768_vm4 = vweird.f32 %v2250_v51  ;;  %v2252_v1 = vpop.eup %2251  ;;  %v590_v31 = vpop.f32.mrf.mxu2 }
  0xe0   : > { %2255 = vrcp.f32 %v649_v52  ;;  %v760_v58 = vsel %vm757_vm3, %v759_v53, %v755_v55  ;;  %vm769_vm7 = vmor %vm767_vm6, %vm768_vm4  ;;  %v2648_v11 = vadd.f32 1.0, %v2252_v1  ;;  %v788_v15 = vand.u32 2147483648, %v649_v52  ;;  %v466_v1 = vld [vmem:[%s2575_s23 + $0x58] sm:$0xff] }
  0xe1   : > { %2130 = vmatmul.msk.f32.gmra.mxu1 %vm909_vm5, %v760_v58  ;;  %v764_v59 = vsub.f32 1.0, %v763_v56  ;;  %2257 = vrcp.f32 %v2640_v57  ;;  %v786_v19 = vand.u32 2147483647, %v649_v52  ;;  %vm782_vm10 = vweird.f32 %v649_v52  ;;  %2167 = vmatmul.msk.f32.vlgmr.msra.gmra.mxu3 %vm1458_vm1, %v466_v1  ;;  %v1332_v1 = vld [vmem:[%s3361_s6 + $0x28] sm:$0xff] }
  0xe2   : > { %2259 = vpow2.f32 %v633_v60  ;;  %v789_v24 = vor.u32 1.1754944e-38, %v788_v15  ;;  %v591_v39 = vadd.f32 %v2566_v27, %v590_v31  ;;  %vm812_vm2 = vweird.f32 %v2640_v57 }
  0xe3   : > { %v765_v62 = vmul.f32 %v2250_v51, %v764_v59  ;;  %vm787_vm12 = vcmp.eq.f32.partialorder %v786_v19, 8.507059e+37  ;;  %v816_v50 = vand.u32 2147483647, %v2640_v57  ;;  %v819_v54 = vor.u32 1.1754944e-38, %v818_v48  ;;  %v2703_v19 = vld [vmem:[%s3364_s9] ss:$0 sm:$0xff] }
  0xe4   : > { %v608_v27 = vsub.f32 0.0, %v591_v39  ;;  %v833_v61 = vand.u32 2147483648, %v2648_v11  ;;  %v831_v63 = vand.u32 2147483647, %v2648_v11 }
  0xe5   : > { %v2254_v2 = vpop.eup %2253  ;;  %v766_v3 = vadd.f32 %v2250_v51, %v765_v62 }
  0xe6   : > { %v2256_v4 = vpop.eup %2255  ;;  %v650_v5 = vadd.f32 1.0, %v2254_v2  ;;  %v639_v53 = vmul.f32 1.442695, %v608_v27 }
  0xe7   : > { %v770_v8 = vsel %vm769_vm7, %v2250_v51, %v766_v3  ;;  %v778_v10 = vmul.f32 %v2256_v4, %v649_v52  ;;  %v2651_v14 = vpop.eup %2257  ;;  %vm783_vm9 = vweird.f32 %v2256_v4  ;;  %vm817_vm7 = vcmp.eq.f32.partialorder %v816_v50, 8.507059e+37 }
  0xe8   : > { %2261 = vrcp.f32 %v650_v5  ;;  %v775_v12 = vsel %vm772_vm8, %v774_v6, %v770_v8  ;;  %v2260_v20 = vpop.eup %2259  ;;  %v808_v22 = vmul.f32 %v2651_v14, %v2640_v57  ;;  %vm784_vm11 = vmor %vm782_vm10, %vm783_vm9  ;;  %v803_v36 = vand.u32 2147483648, %v650_v5 }
  0xe9   : > { %2131 = vmatmul.msk.f32.gmra.mxu1 %vm909_vm5, %v775_v12  ;;  %v779_v13 = vsub.f32 1.0, %v778_v10  ;;  %2263 = vrcp.f32 %v2648_v11  ;;  %v2657_v29 = vadd.f32 1.0, %v2260_v20  ;;  %v801_v38 = vand.u32 2147483647, %v650_v5  ;;  %v467_v20 = vld [vmem:[%s2575_s23 + $0x60] sm:$0xff] }
  0xea   : > { %2265 = vpow2.f32 %v635_v17  ;;  %v809_v33 = vsub.f32 1.0, %v808_v22  ;;  %vm797_vm14 = vweird.f32 %v650_v5  ;;  %v804_v44 = vor.u32 1.1754944e-38, %v803_v36  ;;  %2168 = vmatmul.msk.f32.gmra.mxu3 %vm1458_vm1, %v467_v20  ;;  %v468_v36 = vld [vmem:[%s2575_s23 + $0x68] sm:$0xff] }
  0xeb   : > { %v780_v18 = vmul.f32 %v2256_v4, %v779_v13  ;;  %2267 = vrcp.f32 %v2657_v29  ;;  %vm813_vm3 = vweird.f32 %v2651_v14  ;;  %vm802_vm4 = vcmp.eq.f32.partialorder %v801_v38, 8.507059e+37 }
  0xec   : > { %v810_v42 = vmul.f32 %v2651_v14, %v809_v33  ;;  %2269 = vpow2.f32 %v637_v35  ;;  %vm814_vm6 = vmor %vm812_vm2, %vm813_vm3  ;;  %vm827_vm8 = vweird.f32 %v2648_v11  ;;  %v834_v3 = vor.u32 1.1754944e-38, %v833_v61  ;;  %v1333_v61 = vld [vmem:[%s3361_s6 + $0x30] sm:$0xff] }
  0xed   : > { %v781_v21 = vadd.f32 %v2256_v4, %v780_v18  ;;  %v848_v10 = vand.u32 2147483648, %v2657_v29  ;;  %v846_v12 = vand.u32 2147483647, %v2657_v29 }
  0xee   : > { %v2262_v23 = vpop.eup %2261  ;;  %v811_v49 = vadd.f32 %v2651_v14, %v810_v42 }
  0xef   : > { %v785_v26 = vsel %vm784_vm11, %v2256_v4, %v781_v21  ;;  %v793_v28 = vmul.f32 %v2262_v23, %v650_v5  ;;  %v2660_v34 = vpop.eup %2263  ;;  %vm798_vm13 = vweird.f32 %v2262_v23  ;;  %vm832_vm11 = vcmp.eq.f32.partialorder %v831_v63, 8.507059e+37  ;;  %v1524_v21 = vpop.f32.mrf.mxu0 }
  0xf0   : > { %v790_v30 = vsel %vm787_vm12, %v789_v24, %v785_v26  ;;  %v2266_v40 = vpop.eup %2265  ;;  %v823_v43 = vmul.f32 %v2660_v34, %v2648_v11  ;;  %vm799_vm15 = vmor %vm797_vm14, %vm798_vm13  ;;  %v815_v56 = vsel %vm814_vm6, %v2651_v14, %v811_v49  ;;  %vm828_vm9 = vweird.f32 %v2660_v34 }
  0xf1   : > { %2132 = vmatmul.msk.f32.gmra.mxu1 %vm909_vm5, %v790_v30  ;;  %v794_v32 = vsub.f32 1.0, %v793_v28  ;;  %v2669_v46 = vadd.f32 1.0, %v2266_v40  ;;  %v2268_v52 = vpop.eup %2267  ;;  %v820_v60 = vsel %vm817_vm7, %v819_v54, %v815_v56  ;;  %vm829_vm10 = vmor %vm827_vm8, %vm828_vm9  ;;  %vm842_vm12 = vweird.f32 %v2657_v29  ;;  %v1334_v56 = vld [vmem:[%s3361_s6 + $0x38] sm:$0xff] }
  0xf2   : > { %v824_v51 = vsub.f32 1.0, %v823_v43  ;;  %v2270_v55 = vpop.eup %2269  ;;  %v838_v59 = vmul.f32 %v2268_v52, %v2657_v29  ;;  %vm843_vm13 = vweird.f32 %v2268_v52  ;;  %v849_v15 = vor.u32 1.1754944e-38, %v848_v10  ;;  %2169 = vmatmul.msk.f32.gmra.mxu3 %vm1458_vm1, %v468_v36  ;;  %1395 = vmatpush.msrb.mxu2 %v1334_v56 }
  0xf3   : > { %v795_v37 = vmul.f32 %v2262_v23, %v794_v32  ;;  %2271 = vrcp.f32 %v2669_v46  ;;  %v2681_v57 = vadd.f32 1.0, %v2270_v55  ;;  %vm844_vm14 = vmor %vm842_vm12, %vm843_vm13  ;;  %vm857_vm2 = vweird.f32 %v2669_v46 }
  0xf4   : > { %v825_v58 = vmul.f32 %v2660_v34, %v824_v51  ;;  %2273 = vpow2.f32 %v639_v53  ;;  %v839_v0 = vsub.f32 1.0, %v838_v59  ;;  %v1525_v24 = vadd.f32 %v2703_v19, %v1524_v21  ;;  %v469_v51 = vld [vmem:[%s2575_s23 + $0x70] sm:$0xff]  ;;  %1396 = vmatpush.msrb.mxu2 %v1333_v61 }
  0xf5   : > { %v796_v41 = vadd.f32 %v2262_v23, %v795_v37  ;;  %2275 = vrcp.f32 %v2681_v57  ;;  %v861_v26 = vand.u32 2147483647, %v2669_v46  ;;  %vm872_vm7 = vweird.f32 %v2681_v57 }
  0xf6   : > { %v826_v62 = vadd.f32 %v2660_v34, %v825_v58  ;;  %v840_v6 = vmul.f32 %v2268_v52, %v839_v0  ;;  %v1572_v30 = vsub.f32 0.0, %v1525_v24  ;;  %v878_v39 = vand.u32 2147483648, %v2681_v57  ;;  %1397 = vmatpush.msrb.mxu2 %v1332_v1  ;;  %v1877_v24 = vld [vmem:[%s3365_s10 + $0x8] sm:$0xff] }
  0xf7   : > { %v800_v45 = vsel %vm799_vm15, %v2262_v23, %v796_v41  ;;  %vm847_vm15 = vcmp.eq.f32.partialorder %v846_v12, 8.507059e+37  ;;  %v863_v23 = vand.u32 2147483648, %v2669_v46  ;;  %vm862_vm6 = vcmp.eq.f32.partialorder %v861_v26, 8.507059e+37  ;;  %v1527_v37 = vpop.f32.mrf.mxu0  ;;  %v1879_v12 = vld [vmem:[%s3365_s10 + $0x18] sm:$0xff] }
  0xf8   : > { %v805_v47 = vsel %vm802_vm4, %v804_v44, %v800_v45  ;;  %v830_v5 = vsel %vm829_vm10, %v2660_v34, %v826_v62  ;;  %v841_v11 = vadd.f32 %v2268_v52, %v840_v6  ;;  %v1588_v32 = vmul.f32 1.442695, %v1572_v30  ;;  %v470_v6 = vld [vmem:[%s2575_s23 + $0x78] sm:$0xff]  ;;  %1944 = vmatpush.msrb.mxu3 %v1879_v12 }
  0xf9   : > { %2133 = vmatmul.msk.f32.gmra.mxu1 %vm909_vm5, %v805_v47  ;;  %v2272_v2 = vpop.eup %2271  ;;  %v835_v9 = vsel %vm832_vm11, %v834_v3, %v830_v5  ;;  %v864_v31 = vor.u32 1.1754944e-38, %v863_v23  ;;  %v1528_v40 = vadd.f32 %v2703_v19, %v1527_v37  ;;  %v876_v42 = vand.u32 2147483647, %v2681_v57  ;;  %v1331_v5 = vld [vmem:[%s3361_s6 + $0x20] sm:$0xff]  ;;  %v1328_v23 = vld [vmem:[%s3361_s6 + $0x8] sm:$0xff] }
  0xfa   : > { %v2274_v4 = vpop.eup %2273  ;;  %v853_v7 = vmul.f32 %v2272_v2, %v2669_v46  ;;  %v845_v16 = vsel %vm844_vm14, %v2268_v52, %v841_v11  ;;  %vm858_vm3 = vweird.f32 %v2272_v2  ;;  %v879_v46 = vor.u32 1.1754944e-38, %v878_v39  ;;  %2170 = vmatmul.msk.f32.gmra.mxu3 %vm1458_vm1, %v469_v51  ;;  %1398 = vmatpush.msrb.mxu2 %v1331_v5  ;;  %v1330_v11 = vld [vmem:[%s3361_s6 + $0x18] sm:$0xff] }
  0xfb   : > { %v2693_v8 = vadd.f32 1.0, %v2274_v4  ;;  %v2276_v14 = vpop.eup %2275  ;;  %v850_v22 = vsel %vm847_vm15, %v849_v15, %v845_v16  ;;  %vm859_vm4 = vmor %vm857_vm2, %vm858_vm3  ;;  %v1573_v45 = vsub.f32 0.0, %v1528_v40  ;;  %vm877_vm10 = vcmp.eq.f32.partialorder %v876_v42, 8.507059e+37  ;;  %v1329_v15 = vld [vmem:[%s3361_s6 + $0x10] sm:$0xff] }
  0xfc   : > { %v854_v13 = vsub.f32 1.0, %v853_v7  ;;  %v868_v18 = vmul.f32 %v2276_v14, %v2681_v57  ;;  %vm873_vm8 = vweird.f32 %v2276_v14  ;;  %1399 = vmatpush.msrb.mxu2 %v1330_v11  ;;  %v1878_v16 = vld [vmem:[%s3365_s10 + $0x10] sm:$0xff] }
  0xfd   : > { %2277 = vrcp.f32 %v2693_v8  ;;  %vm2723_vm9 = vmor %vm872_vm7, %vm873_vm8  ;;  %v1590_v47 = vmul.f32 1.442695, %v1573_v45  ;;  %vm887_vm11 = vweird.f32 %v2693_v8  ;;  %v893_v54 = vand.u32 2147483648, %v2693_v8  ;;  %1945 = vmatpush.msrb.mxu3 %v1878_v16 }
  0xfe   : > { %v855_v17 = vmul.f32 %v2272_v2, %v854_v13  ;;  %v869_v28 = vsub.f32 1.0, %v868_v18  ;;  %2279 = vpow2.f32 %v1588_v32  ;;  %v891_v59 = vand.u32 2147483647, %v2693_v8  ;;  %v2784_v18 = vld [vmem:[%s3360_s5] ss:$0 sm:$0xff]  ;;  %1400 = vmatpush.msrb.mxu2 %v1329_v15 }
  0xff   : > { %2281 = vpow2.f32 %v1590_v47  ;;  %v1530_v52 = vpop.f32.mrf.mxu0  ;;  %v894_v63 = vor.u32 1.1754944e-38, %v893_v54  ;;  %1946 = vmatpush.msrb.mxu3 %v1877_v24 }
 0x100   : > { %v856_v25 = vadd.f32 %v2272_v2, %v855_v17  ;;  %v870_v34 = vmul.f32 %v2276_v14, %v869_v28  ;;  %v1531_v55 = vadd.f32 %v2703_v19, %v1530_v52  ;;  %vm892_vm14 = vcmp.eq.f32.partialorder %v891_v59, 8.507059e+37  ;;  %1401 = vmatpush.msrb.mxu2 %v1328_v23 }
 0x101   : > { %2134 = vmatmul.msk.f32.gmra.mxu1 %vm909_vm5, %v820_v60 }
 0x102   : > { %v860_v33 = vsel %vm859_vm4, %v2272_v2, %v856_v25  ;;  %v871_v41 = vadd.f32 %v2276_v14, %v870_v34  ;;  %v1574_v60 = vsub.f32 0.0, %v1531_v55  ;;  %2171 = vmatmul.msk.f32.gmra.mxu3 %vm1458_vm1, %v470_v6  ;;  %v1327_v34 = vld [vmem:[%s3361_s6] sm:$0xff] }
 0x103   : > { %v2712_v29 = vpop.eup %2277  ;;  %v865_v38 = vsel %vm862_vm6, %v864_v31, %v860_v33  ;;  %v465_v33 = vld [vmem:[%s2575_s23 + $0x50] sm:$0xff]  ;;  %1402 = vmatpush.msrb.mxu2 %v1327_v34 }
 0x104   : > { %v883_v35 = vmul.f32 %v2712_v29, %v2693_v8  ;;  %v2280_v27 = vpop.eup %2279  ;;  %v875_v48 = vsel %vm2723_vm9, %v2276_v14, %v871_v41  ;;  %vm888_vm12 = vweird.f32 %v2712_v29  ;;  %v1592_v0 = vmul.f32 1.442695, %v1574_v60 }
 0x105   : > { %v2730_v50 = vadd.f32 1.0, %v2280_v27  ;;  %v880_v53 = vsel %vm877_vm10, %v879_v46, %v875_v48  ;;  %vm2745_vm13 = vmor %vm887_vm11, %vm888_vm12  ;;  %v2282_v62 = vpop.eup %2281 }
 0x106   : > { %v884_v43 = vsub.f32 1.0, %v883_v35  ;;  %v2758_v4 = vadd.f32 1.0, %v2282_v62  ;;  %v1876_v35 = vld [vmem:[%s3365_s10] sm:$0xff] }
 0x107   : > { %2283 = vrcp.f32 %v2730_v50  ;;  %v1533_v8 = vpop.f32.mrf.mxu0  ;;  %v1647_v20 = vand.u32 2147483648, %v2730_v50  ;;  %vm1641_vm15 = vweird.f32 %v2730_v50  ;;  %v1645_v30 = vand.u32 2147483647, %v2730_v50  ;;  %1947 = vmatpush.msrb.mxu3 %v1876_v35 }
 0x108   : > { %v885_v49 = vmul.f32 %v2712_v29, %v884_v43  ;;  %2285 = vpow2.f32 %v1592_v0  ;;  %v1534_v10 = vadd.f32 %v2703_v19, %v1533_v8  ;;  %v1662_v46 = vand.u32 2147483648, %v2758_v4 }
 0x109   : > { %2135 = vmatmul.msk.f32.gmra.mxu1 %vm909_vm5, %v835_v9  ;;  %2287 = vrcp.f32 %v2758_v4  ;;  %v1648_v31 = vor.u32 1.1754944e-38, %v1647_v20  ;;  %vm1646_vm4 = vcmp.eq.f32.partialorder %v1645_v30, 8.507059e+37  ;;  %vm1656_vm6 = vweird.f32 %v2758_v4 }
 0x10a   : > { %v886_v58 = vadd.f32 %v2712_v29, %v885_v49  ;;  %v1575_v14 = vsub.f32 0.0, %v1534_v10  ;;  %v1660_v52 = vand.u32 2147483647, %v2758_v4 }
 0x10c   : > { %v890_v3 = vsel %vm2745_vm13, %v2712_v29, %v886_v58 }
 0x10d   : > { %v2284_v2 = vpop.eup %2283  ;;  %v895_v9 = vsel %vm892_vm14, %v894_v63, %v890_v3 }
 0x10e   : > { %v1637_v7 = vmul.f32 %v2284_v2, %v2730_v50  ;;  %v2286_v21 = vpop.eup %2285  ;;  %vm1642_vm2 = vweird.f32 %v2284_v2 }
 0x10f   : > { %v2288_v26 = vpop.eup %2287  ;;  %v2794_v28 = vadd.f32 1.0, %v2286_v21  ;;  %vm2796_vm3 = vmor %vm1641_vm15, %vm1642_vm2  ;;  %v1536_v39 = vpop.f32.mrf.mxu0 }
 0x110   : > { %v1638_v13 = vsub.f32 1.0, %v1637_v7  ;;  %v1652_v37 = vmul.f32 %v2288_v26, %v2758_v4  ;;  %v1537_v40 = vadd.f32 %v2703_v19, %v1536_v39  ;;  %vm1657_vm7 = vweird.f32 %v2288_v26 }
 0x111   : > { %2136 = vmatmul.msk.f32.gmra.mxu1 %vm909_vm5, %v850_v22  ;;  %v1594_v22 = vmul.f32 1.442695, %v1575_v14  ;;  %vm1658_vm8 = vmor %vm1656_vm6, %vm1657_vm7  ;;  %v1677_v3 = vand.u32 2147483648, %v2794_v28  ;;  %vm1671_vm9 = vweird.f32 %v2794_v28 }
 0x112   : > { %v1639_v17 = vmul.f32 %v2284_v2, %v1638_v13  ;;  %v1653_v42 = vsub.f32 1.0, %v1652_v37  ;;  %v1576_v44 = vsub.f32 0.0, %v1537_v40 }
 0x113   : > { %2289 = vpow2.f32 %v1594_v22 }
 0x114   : > { %v1640_v25 = vadd.f32 %v2284_v2, %v1639_v17  ;;  %2291 = vrcp.f32 %v2794_v28  ;;  %v1654_v45 = vmul.f32 %v2288_v26, %v1653_v42  ;;  %v1596_v48 = vmul.f32 1.442695, %v1576_v44 }
 0x115   : > { %v1678_v17 = vor.u32 1.1754944e-38, %v1677_v3 }
 0x116   : > { %v1644_v36 = vsel %vm2796_vm3, %v2284_v2, %v1640_v25  ;;  %v1655_v49 = vadd.f32 %v2288_v26, %v1654_v45 }
 0x117   : > { %v1649_v41 = vsel %vm1646_vm4, %v1648_v31, %v1644_v36  ;;  %v1539_v59 = vpop.f32.mrf.mxu0 }
 0x118   : > { %2172 = vmatmul.msk.f32.vlgmr.msrb.gmra.mxu3 %vm479_vm0, %v1649_v41  ;;  %v1659_v55 = vsel %vm1658_vm8, %v2288_v26, %v1655_v49  ;;  %v1540_v57 = vadd.f32 %v2703_v19, %v1539_v59 }
 0x119   : > { %2137 = vmatmul.msk.f32.gmra.mxu1 %vm909_vm5, %v865_v38  ;;  %v2290_v47 = vpop.eup %2289 }
 0x11a   : > { %v2292_v50 = vpop.eup %2291  ;;  %v2818_v51 = vadd.f32 1.0, %v2290_v47  ;;  %v1577_v63 = vsub.f32 0.0, %v1540_v57 }
 0x11b   : > { %v1667_v56 = vmul.f32 %v2292_v50, %v2794_v28  ;;  %vm1672_vm10 = vweird.f32 %v2292_v50 }
 0x11c   : > { %v1598_v6 = vmul.f32 1.442695, %v1577_v63  ;;  %vm1673_vm11 = vmor %vm1671_vm9, %vm1672_vm10  ;;  %vm1686_vm13 = vweird.f32 %v2818_v51  ;;  %v1692_v36 = vand.u32 2147483648, %v2818_v51 }
 0x11d   : > { %v1668_v61 = vsub.f32 1.0, %v1667_v56 }
 0x11f   : > { %v1669_v0 = vmul.f32 %v2292_v50, %v1668_v61  ;;  %v1542_v13 = vpop.f32.mrf.mxu0 }
 0x120   : > { %v1543_v14 = vadd.f32 %v2703_v19, %v1542_v13 }
 0x121   : > { %2138 = vmatmul.msk.f32.gmra.mxu1 %vm909_vm5, %v880_v53  ;;  %v1663_v53 = vor.u32 1.1754944e-38, %v1662_v46  ;;  %v1670_v7 = vadd.f32 %v2292_v50, %v1669_v0 }
 0x122   : > { %v1578_v21 = vsub.f32 0.0, %v1543_v14 }
 0x123   : > { %v1674_v15 = vsel %vm1673_vm11, %v2292_v50, %v1670_v7 }
 0x124   : > { %v1600_v29 = vmul.f32 1.442695, %v1578_v21 }
 0x129   : > { %2139 = vmatmul.msk.f32.gmra.mxu1 %vm909_vm5, %v895_v9  ;;  %v1675_v9 = vand.u32 2147483647, %v2794_v28 }
 0x12b   : > { %vm1676_vm12 = vcmp.eq.f32.partialorder %v1675_v9, 8.507059e+37 }
 0x12c   : > { %v1679_v24 = vsel %vm1676_vm12, %v1678_v17, %v1674_v15 }
 0x12d   : > { %v1545_v41 = vpop.f32.mrf.mxu0 }
 0x12e   : > { %v975_v32 = vpop.f32.mrf.mxu1  ;;  %v1546_v44 = vadd.f32 %v2703_v19, %v1545_v41 }
 0x12f   : > { %v976_v38 = vadd.f32 %v2784_v18, %v975_v32 }
 0x130   : > { %v1579_v49 = vsub.f32 0.0, %v1546_v44 }
 0x131   : > { %v1023_v43 = vsub.f32 0.0, %v976_v38  ;;  %2166 = vmatmul.msk.f32.vlgmr.msra.gmra.mxu1 %vm1458_vm1, %v465_v33  ;;  %vm1661_vm1 = vcmp.eq.f32.partialorder %v1660_v52, 8.507059e+37  ;;  %v1693_v52 = vor.u32 1.1754944e-38, %v1692_v36 }
 0x132   : > { %v1664_v60 = vsel %vm1661_vm1, %v1663_v53, %v1659_v55 }
 0x133   : > { %v1039_v27 = vmul.f32 1.442695, %v1023_v43  ;;  %2173 = vmatmul.msk.f32.gmra.mxu3 %vm479_vm0, %v1664_v60 }
 0x135   : > { %2293 = vpow2.f32 %v1039_v27 }
 0x136   : > { %v978_v54 = vpop.f32.mrf.mxu1  ;;  %2295 = vpow2.f32 %v1596_v48  ;;  %v1690_v48 = vand.u32 2147483647, %v2818_v51 }
 0x137   : > { %v979_v58 = vadd.f32 %v2784_v18, %v978_v54  ;;  %2297 = vrcp.f32 %v2818_v51 }
 0x138   : > { %vm1691_vm4 = vcmp.eq.f32.partialorder %v1690_v48, 8.507059e+37 }
 0x139   : > { %v1024_v62 = vsub.f32 0.0, %v979_v58 }
 0x13b   : > { %v2294_v1 = vpop.eup %2293  ;;  %v1041_v2 = vmul.f32 1.442695, %v1024_v62  ;;  %2174 = vmatmul.msk.f32.gmra.mxu3 %vm479_vm0, %v1679_v24 }
 0x13c   : > { %v2296_v4 = vpop.eup %2295  ;;  %v2827_v5 = vadd.f32 1.0, %v2294_v1 }
 0x13d   : > { %2299 = vpow2.f32 %v1041_v2  ;;  %v2830_v8 = vadd.f32 1.0, %v2296_v4  ;;  %v2833_v10 = vpop.eup %2297  ;;  %v1602_v2 = vmul.f32 1.442695, %v1579_v49  ;;  %v1548_v7 = vpop.f32.mrf.mxu0 }
 0x13e   : > { %2301 = vrcp.f32 %v2827_v5  ;;  %v981_v11 = vpop.f32.mrf.mxu1  ;;  %v1682_v20 = vmul.f32 %v2833_v10, %v2818_v51  ;;  %vm1687_vm14 = vweird.f32 %v2833_v10  ;;  %vm1092_vm15 = vweird.f32 %v2827_v5 }
 0x13f   : > { %v982_v12 = vadd.f32 %v2784_v18, %v981_v11  ;;  %2303 = vpow2.f32 %v1598_v6  ;;  %v1096_v34 = vand.u32 2147483647, %v2827_v5  ;;  %v1098_v35 = vand.u32 2147483648, %v2827_v5  ;;  %vm2862_vm2 = vmor %vm1686_vm13, %vm1687_vm14 }
 0x140   : > { %2305 = vrcp.f32 %v2830_v8  ;;  %v1683_v25 = vsub.f32 1.0, %v1682_v20  ;;  %vm1701_vm10 = vweird.f32 %v2830_v8  ;;  %v1707_v15 = vand.u32 2147483648, %v2830_v8 }
 0x141   : > { %v1025_v16 = vsub.f32 0.0, %v982_v12  ;;  %v1099_v51 = vor.u32 1.1754944e-38, %v1098_v35  ;;  %vm1097_vm7 = vcmp.eq.f32.partialorder %v1096_v34, 8.507059e+37 }
 0x142   : > { %v1684_v31 = vmul.f32 %v2833_v10, %v1683_v25 }
 0x143   : > { %v2300_v22 = vpop.eup %2299  ;;  %v1043_v23 = vmul.f32 1.442695, %v1025_v16 }
 0x144   : > { %v2302_v26 = vpop.eup %2301  ;;  %v2841_v28 = vadd.f32 1.0, %v2300_v22  ;;  %v1685_v45 = vadd.f32 %v2833_v10, %v1684_v31 }
 0x145   : > { %2307 = vpow2.f32 %v1043_v23  ;;  %v1088_v30 = vmul.f32 %v2302_v26, %v2827_v5  ;;  %v2304_v32 = vpop.eup %2303  ;;  %vm1093_vm3 = vweird.f32 %v2302_v26 }
 0x146   : > { %2309 = vrcp.f32 %v2841_v28  ;;  %v984_v33 = vpop.f32.mrf.mxu1  ;;  %v2853_v37 = vpop.eup %2305  ;;  %v2856_v40 = vadd.f32 1.0, %v2304_v32  ;;  %v1111_v43 = vand.u32 2147483647, %v2841_v28  ;;  %v1113_v47 = vand.u32 2147483648, %v2841_v28  ;;  %vm1094_vm6 = vmor %vm1092_vm15, %vm1093_vm3 }
 0x147   : > { %v985_v38 = vadd.f32 %v2784_v18, %v984_v33  ;;  %v1089_v39 = vsub.f32 1.0, %v1088_v30  ;;  %2311 = vpow2.f32 %v1600_v29  ;;  %v1689_v50 = vsel %vm2862_vm2, %v2833_v10, %v1685_v45 }
 0x148   : > { %v1697_v53 = vmul.f32 %v2853_v37, %v2830_v8  ;;  %2313 = vrcp.f32 %v2856_v40  ;;  %v1694_v57 = vsel %vm1691_vm4, %v1693_v52, %v1689_v50  ;;  %vm1107_vm8 = vweird.f32 %v2841_v28 }
 0x149   : > { %v1026_v27 = vsub.f32 0.0, %v985_v38  ;;  %v1090_v46 = vmul.f32 %v2302_v26, %v1089_v39  ;;  %2175 = vmatmul.msk.f32.gmra.mxu3 %vm479_vm0, %v1694_v57  ;;  %vm2888_vm1 = vcmp.eq.f32.partialorder %v1111_v43, 8.507059e+37  ;;  %v1114_v6 = vor.u32 1.1754944e-38, %v1113_v47  ;;  %v1551_v43 = vpop.f32.mrf.mxu0 }
 0x14a   : > { %v1698_v60 = vsub.f32 1.0, %v1697_v53  ;;  %v1549_v10 = vadd.f32 %v2703_v19, %v1548_v7  ;;  %vm1702_vm11 = vweird.f32 %v2853_v37  ;;  %v1708_v38 = vor.u32 1.1754944e-38, %v1707_v15 }
 0x14b   : > { %v2308_v54 = vpop.eup %2307  ;;  %v1045_v55 = vmul.f32 1.442695, %v1026_v27  ;;  %v1091_v56 = vadd.f32 %v2302_v26, %v1090_v46  ;;  %vm2916_vm13 = vmor %vm1701_vm10, %vm1702_vm11  ;;  %v1552_v27 = vadd.f32 %v2703_v19, %v1551_v43  ;;  %vm1716_vm4 = vweird.f32 %v2856_v40 }
 0x14c   : > { %v2310_v58 = vpop.eup %2309  ;;  %v2877_v59 = vadd.f32 1.0, %v2308_v54  ;;  %v1699_v11 = vmul.f32 %v2853_v37, %v1698_v60  ;;  %v1580_v17 = vsub.f32 0.0, %v1549_v10  ;;  %v1722_v10 = vand.u32 2147483648, %v2856_v40 }
 0x14d   : > { %v2312_v61 = vpop.eup %2311  ;;  %2315 = vpow2.f32 %v1045_v55  ;;  %v1095_v62 = vsel %vm1094_vm6, %v2302_v26, %v1091_v56  ;;  %v1103_v63 = vmul.f32 %v2310_v58, %v2841_v28  ;;  %vm1108_vm9 = vweird.f32 %v2310_v58 }
 0x14e   : > { %2317 = vrcp.f32 %v2877_v59  ;;  %v987_v0 = vpop.f32.mrf.mxu1  ;;  %v1100_v1 = vsel %vm1097_vm7, %v1099_v51, %v1095_v62  ;;  %v2892_v9 = vadd.f32 1.0, %v2312_v61  ;;  %v2896_v12 = vpop.eup %2313  ;;  %v1126_v16 = vand.u32 2147483647, %v2877_v59  ;;  %vm2905_vm12 = vmor %vm1107_vm8, %vm1108_vm9 }
 0x14f   : > { %v988_v3 = vadd.f32 %v2784_v18, %v987_v0  ;;  %2140 = vmatmul.msk.f32.vlgmr.msrb.gmra.mxu2 %vm909_vm5, %v1100_v1  ;;  %v1104_v4 = vsub.f32 1.0, %v1103_v63  ;;  %2319 = vpow2.f32 %v1602_v2  ;;  %v1128_v24 = vand.u32 2147483648, %v2877_v59 }
 0x150   : > { %v1700_v25 = vadd.f32 %v2853_v37, %v1699_v11  ;;  %2321 = vrcp.f32 %v2892_v9  ;;  %v1705_v28 = vand.u32 2147483647, %v2830_v8  ;;  %v1712_v31 = vmul.f32 %v2896_v12, %v2856_v40 }
 0x151   : > { %v1027_v13 = vsub.f32 0.0, %v988_v3  ;;  %v1105_v14 = vmul.f32 %v2310_v58, %v1104_v4  ;;  %v1604_v34 = vmul.f32 1.442695, %v1580_v17  ;;  %vm1122_vm14 = vweird.f32 %v2877_v59 }
 0x152   : > { %vm2932_vm15 = vcmp.eq.f32.partialorder %v1126_v16, 8.507059e+37  ;;  %v1704_v42 = vsel %vm2916_vm13, %v2853_v37, %v1700_v25  ;;  %v1129_v45 = vor.u32 1.1754944e-38, %v1128_v24  ;;  %vm1706_vm2 = vcmp.eq.f32.partialorder %v1705_v28, 8.507059e+37 }
 0x153   : > { %v2316_v20 = vpop.eup %2315  ;;  %v1047_v21 = vmul.f32 1.442695, %v1027_v13  ;;  %v1106_v22 = vadd.f32 %v2310_v58, %v1105_v14  ;;  %v1713_v46 = vsub.f32 1.0, %v1712_v31  ;;  %v1709_v52 = vsel %vm1706_vm2, %v1708_v38, %v1704_v42 }
 0x154   : > { %v2318_v26 = vpop.eup %2317  ;;  %v2911_v29 = vadd.f32 1.0, %v2316_v20  ;;  %v1581_v53 = vsub.f32 0.0, %v1552_v27  ;;  %2176 = vmatmul.msk.f32.gmra.mxu3 %vm479_vm0, %v1709_v52  ;;  %vm1717_vm6 = vweird.f32 %v2896_v12  ;;  %v1720_v63 = vand.u32 2147483647, %v2856_v40 }
 0x155   : > { %2323 = vpow2.f32 %v1047_v21  ;;  %v1110_v32 = vsel %vm2905_vm12, %v2310_v58, %v1106_v22  ;;  %v1118_v33 = vmul.f32 %v2318_v26, %v2877_v59  ;;  %v2320_v44 = vpop.eup %2319  ;;  %vm1123_vm3 = vweird.f32 %v2318_v26  ;;  %vm2965_vm8 = vmor %vm1716_vm4, %vm1717_vm6 }
 0x156   : > { %2325 = vrcp.f32 %v2911_v29  ;;  %v990_v35 = vpop.f32.mrf.mxu1  ;;  %v1115_v36 = vsel %vm2888_vm1, %v1114_v6, %v1110_v32  ;;  %v2940_v49 = vpop.eup %2321  ;;  %v2942_v50 = vadd.f32 1.0, %v2320_v44  ;;  %v1714_v54 = vmul.f32 %v2896_v12, %v1713_v46  ;;  %vm1124_vm7 = vmor %vm1122_vm14, %vm1123_vm3 }
 0x157   : > { %v991_v8 = vadd.f32 %v2784_v18, %v990_v35  ;;  %2141 = vmatmul.msk.f32.gmra.mxu2 %vm909_vm5, %v1115_v36  ;;  %v1119_v39 = vsub.f32 1.0, %v1118_v33  ;;  %2327 = vpow2.f32 %v1604_v34  ;;  %v1141_v51 = vand.u32 2147483647, %v2911_v29 }
 0x158   : > { %v1143_v57 = vand.u32 2147483648, %v2911_v29  ;;  %v1715_v60 = vadd.f32 %v2896_v12, %v1714_v54  ;;  %v1606_v59 = vmul.f32 1.442695, %v1581_v53  ;;  %vm1137_vm1 = vweird.f32 %v2911_v29 }
 0x159   : > { %v1028_v47 = vsub.f32 0.0, %v991_v8  ;;  %v1120_v48 = vmul.f32 %v2318_v26, %v1119_v39  ;;  %vm2973_vm10 = vcmp.eq.f32.partialorder %v1141_v51, 8.507059e+37  ;;  %vm1721_vm11 = vcmp.eq.f32.partialorder %v1720_v63, 8.507059e+37 }
 0x15a   : > { %v1144_v7 = vor.u32 1.1754944e-38, %v1143_v57  ;;  %v1719_v14 = vsel %vm2965_vm8, %v2896_v12, %v1715_v60  ;;  %v1723_v16 = vor.u32 1.1754944e-38, %v1722_v10  ;;  %v1727_v17 = vmul.f32 %v2940_v49, %v2892_v9 }
 0x15b   : > { %v2324_v37 = vpop.eup %2323  ;;  %v1049_v55 = vmul.f32 1.442695, %v1028_v47  ;;  %v1121_v56 = vadd.f32 %v2318_v26, %v1120_v48  ;;  %vm1731_vm14 = vweird.f32 %v2892_v9  ;;  %v1735_v32 = vand.u32 2147483647, %v2892_v9 }
 0x15c   : > { %v2326_v19 = vpop.eup %2325  ;;  %v2948_v58 = vadd.f32 1.0, %v2324_v37  ;;  %v1724_v12 = vsel %vm1721_vm11, %v1723_v16, %v1719_v14  ;;  %v1737_v34 = vand.u32 2147483648, %v2892_v9  ;;  %v1752_v51 = vand.u32 2147483648, %v2942_v50 }
 0x15d   : > { %2329 = vpow2.f32 %v1049_v55  ;;  %v1125_v61 = vsel %vm1124_vm7, %v2318_v26, %v1121_v56  ;;  %v1133_v62 = vmul.f32 %v2326_v19, %v2911_v29  ;;  %v2328_v3 = vpop.eup %2327  ;;  %vm1138_vm9 = vweird.f32 %v2326_v19  ;;  %2177 = vmatmul.msk.f32.gmra.mxu3 %vm479_vm0, %v1724_v12 }
 0x15e   : > { %2331 = vrcp.f32 %v2948_v58  ;;  %v993_v0 = vpop.f32.mrf.mxu1  ;;  %v1130_v1 = vsel %vm2932_vm15, %v1129_v45, %v1125_v61  ;;  %v2981_v15 = vadd.f32 1.0, %v2328_v3  ;;  %vm1152_vm12 = vweird.f32 %v2948_v58  ;;  %vm1139_vm13 = vmor %vm1137_vm1, %vm1138_vm9 }
 0x15f   : > { %v994_v4 = vadd.f32 %v2784_v18, %v993_v0  ;;  %2142 = vmatmul.msk.f32.gmra.mxu2 %vm909_vm5, %v1130_v1  ;;  %2333 = vrcp.f32 %v2942_v50  ;;  %v1134_v5 = vsub.f32 1.0, %v1133_v62  ;;  %v1156_v40 = vand.u32 2147483647, %v2948_v58 }
 0x160   : > { %2335 = vpow2.f32 %v1606_v59  ;;  %v1158_v23 = vand.u32 2147483648, %v2948_v58  ;;  %v1728_v26 = vsub.f32 1.0, %v1727_v17  ;;  %vm1732_vm15 = vweird.f32 %v2940_v49 }
 0x161   : > { %v1029_v11 = vsub.f32 0.0, %v994_v4  ;;  %v1135_v13 = vmul.f32 %v2326_v19, %v1134_v5  ;;  %vm3008_vm3 = vcmp.eq.f32.partialorder %v1156_v40, 8.507059e+37  ;;  %vm3020_vm4 = vmor %vm1731_vm14, %vm1732_vm15  ;;  %vm3024_vm6 = vcmp.eq.f32.partialorder %v1735_v32, 8.507059e+37 }
 0x162   : > { %v1729_v38 = vmul.f32 %v2940_v49, %v1728_v26  ;;  %v1159_v41 = vor.u32 1.1754944e-38, %v1158_v23  ;;  %v1738_v48 = vor.u32 1.1754944e-38, %v1737_v34  ;;  %vm1746_vm7 = vweird.f32 %v2942_v50 }
 0x163   : > { %v2330_v20 = vpop.eup %2329  ;;  %v1051_v21 = vmul.f32 1.442695, %v1029_v11  ;;  %v1136_v22 = vadd.f32 %v2326_v19, %v1135_v13  ;;  %v1750_v62 = vand.u32 2147483647, %v2942_v50  ;;  %v1753_v5 = vor.u32 1.1754944e-38, %v1752_v51 }
 0x164   : > { %v2332_v24 = vpop.eup %2331  ;;  %v2988_v25 = vadd.f32 1.0, %v2330_v20  ;;  %v1730_v47 = vadd.f32 %v2940_v49, %v1729_v38  ;;  %vm1761_vm14 = vweird.f32 %v2981_v15  ;;  %v1767_v26 = vand.u32 2147483648, %v2981_v15 }
 0x165   : > { %v2994_v30 = vpop.eup %2333  ;;  %2337 = vpow2.f32 %v1051_v21  ;;  %v1140_v28 = vsel %vm1139_vm13, %v2326_v19, %v1136_v22  ;;  %v1148_v31 = vmul.f32 %v2332_v24, %v2948_v58  ;;  %vm1153_vm2 = vweird.f32 %v2332_v24 }
 0x166   : > { %2339 = vrcp.f32 %v2988_v25  ;;  %v996_v33 = vpop.f32.mrf.mxu1  ;;  %v1145_v29 = vsel %vm2973_vm10, %v1144_v7, %v1140_v28  ;;  %v2336_v8 = vpop.eup %2335  ;;  %v1742_v42 = vmul.f32 %v2994_v30, %v2942_v50  ;;  %vm1747_vm8 = vweird.f32 %v2994_v30  ;;  %vm1154_vm1 = vmor %vm1152_vm12, %vm1153_vm2 }
 0x167   : > { %v997_v35 = vadd.f32 %v2784_v18, %v996_v33  ;;  %2143 = vmatmul.msk.f32.gmra.mxu2 %vm909_vm5, %v1145_v29  ;;  %2341 = vrcp.f32 %v2981_v15  ;;  %v1149_v36 = vsub.f32 1.0, %v1148_v31  ;;  %v3014_v45 = vadd.f32 1.0, %v2336_v8  ;;  %vm3059_vm9 = vmor %vm1746_vm7, %vm1747_vm8 }
 0x168   : > { %v1743_v52 = vsub.f32 1.0, %v1742_v42  ;;  %v1734_v56 = vsel %vm3020_vm4, %v2940_v49, %v1730_v47  ;;  %v1171_v49 = vand.u32 2147483647, %v2988_v25  ;;  %v1173_v0 = vand.u32 2147483648, %v2988_v25 }
 0x169   : > { %v1030_v43 = vsub.f32 0.0, %v997_v35  ;;  %v1150_v44 = vmul.f32 %v2332_v24, %v1149_v36  ;;  %2343 = vrcp.f32 %v3014_v45  ;;  %v1739_v2 = vsel %vm3024_vm6, %v1738_v48, %v1734_v56 }
 0x16a   : > { %v1744_v19 = vmul.f32 %v2994_v30, %v1743_v52  ;;  %2178 = vmatmul.msk.f32.gmra.mxu3 %vm479_vm0, %v1739_v2  ;;  %vm1751_vm11 = vcmp.eq.f32.partialorder %v1750_v62, 8.507059e+37  ;;  %vm1167_vm12 = vweird.f32 %v2988_v25  ;;  %vm3070_vm13 = vcmp.eq.f32.partialorder %v1171_v49, 8.507059e+37 }
 0x16b   : > { %v2338_v53 = vpop.eup %2337  ;;  %v1053_v54 = vmul.f32 1.442695, %v1030_v43  ;;  %v1151_v37 = vadd.f32 %v2332_v24, %v1150_v44  ;;  %v1174_v13 = vor.u32 1.1754944e-38, %v1173_v0  ;;  %v1765_v32 = vand.u32 2147483647, %v2981_v15 }
 0x16c   : > { %v2340_v9 = vpop.eup %2339  ;;  %v3032_v55 = vadd.f32 1.0, %v2338_v53  ;;  %v1745_v4 = vadd.f32 %v2994_v30, %v1744_v19  ;;  %v1768_v42 = vor.u32 1.1754944e-38, %v1767_v26 }
 0x16d   : > { %v3042_v57 = vpop.eup %2341  ;;  %2345 = vpow2.f32 %v1053_v54  ;;  %v1155_v60 = vsel %vm1154_vm1, %v2332_v24, %v1151_v37  ;;  %v1163_v61 = vmul.f32 %v2340_v9, %v2988_v25  ;;  %vm1168_vm10 = vweird.f32 %v2340_v9 }
 0x16e   : > { %2347 = vrcp.f32 %v3032_v55  ;;  %v999_v58 = vpop.f32.mrf.mxu1  ;;  %v1160_v63 = vsel %vm3008_vm3, %v1159_v41, %v1155_v60  ;;  %v1757_v11 = vmul.f32 %v3042_v57, %v2981_v15  ;;  %v1749_v14 = vsel %vm3059_vm9, %v2994_v30, %v1745_v4  ;;  %vm1169_vm15 = vmor %vm1167_vm12, %vm1168_vm10 }
 0x16f   : > { %v1000_v1 = vadd.f32 %v2784_v18, %v999_v58  ;;  %2144 = vmatmul.msk.f32.gmra.mxu2 %vm909_vm5, %v1160_v63  ;;  %v1164_v59 = vsub.f32 1.0, %v1163_v61  ;;  %v3065_v6 = vpop.eup %2343  ;;  %v1754_v23 = vsel %vm1751_vm11, %v1753_v5, %v1749_v14  ;;  %vm1762_vm2 = vweird.f32 %v3042_v57 }
 0x170   : > { %v1758_v21 = vsub.f32 1.0, %v1757_v11  ;;  %v1772_v24 = vmul.f32 %v3065_v6, %v3014_v45  ;;  %v1186_v31 = vand.u32 2147483647, %v3032_v55  ;;  %v1188_v34 = vand.u32 2147483648, %v3032_v55  ;;  %vm3100_vm4 = vmor %vm1761_vm14, %vm1762_vm2 }
 0x171   : > { %v1031_v7 = vsub.f32 0.0, %v1000_v1  ;;  %v1165_v10 = vmul.f32 %v2340_v9, %v1164_v59  ;;  %vm1182_vm6 = vweird.f32 %v3032_v55  ;;  %vm3110_vm8 = vcmp.eq.f32.partialorder %v1765_v32, 8.507059e+37 }
 0x172   : > { %v1759_v35 = vmul.f32 %v3042_v57, %v1758_v21  ;;  %2179 = vmatmul.msk.f32.gmra.mxu3 %vm479_vm0, %v1754_v23  ;;  %v1773_v38 = vsub.f32 1.0, %v1772_v24  ;;  %vm3106_vm7 = vcmp.eq.f32.partialorder %v1186_v31, 8.507059e+37  ;;  %v1189_v48 = vor.u32 1.1754944e-38, %v1188_v34  ;;  %v3153_v23 = vpop.f32.mrf.mxu3 }
 0x173   : > { %v2346_v16 = vpop.eup %2345  ;;  %v1055_v17 = vmul.f32 1.442695, %v1031_v7  ;;  %v1166_v20 = vadd.f32 %v2340_v9, %v1165_v10  ;;  %vm1776_vm9 = vweird.f32 %v3014_v45  ;;  %vm1777_vm10 = vweird.f32 %v3065_v6 }
 0x174   : > { %v2348_v22 = vpop.eup %2347  ;;  %v3078_v40 = vadd.f32 1.0, %v2346_v16  ;;  %v1760_v41 = vadd.f32 %v3042_v57, %v1759_v35  ;;  %v1774_v15 = vmul.f32 %v3065_v6, %v1773_v38  ;;  %v1782_v37 = vand.u32 2147483648, %v3014_v45  ;;  %vm3136_vm11 = vmor %vm1776_vm9, %vm1777_vm10 }
 0x175   : > { %2349 = vpow2.f32 %v1055_v17  ;;  %v1170_v25 = vsel %vm1169_vm15, %v2340_v9, %v1166_v20  ;;  %v1178_v12 = vmul.f32 %v2348_v22, %v3032_v55  ;;  %vm1183_vm3 = vweird.f32 %v2348_v22 }
 0x176   : > { %2351 = vrcp.f32 %v3078_v40  ;;  %v1002_v30 = vpop.f32.mrf.mxu1  ;;  %v1175_v28 = vsel %vm3070_vm13, %v1174_v13, %v1170_v25  ;;  %v1764_v52 = vsel %vm3100_vm4, %v3042_v57, %v1760_v41  ;;  %vm1184_vm1 = vmor %vm1182_vm6, %vm1183_vm3  ;;  %v1775_v57 = vadd.f32 %v3065_v6, %v1774_v15 }
 0x177   : > { %v1003_v33 = vadd.f32 %v2784_v18, %v1002_v30  ;;  %2145 = vmatmul.msk.f32.gmra.mxu2 %vm909_vm5, %v1175_v28  ;;  %v1179_v29 = vsub.f32 1.0, %v1178_v12  ;;  %v1769_v56 = vsel %vm3110_vm8, %v1768_v42, %v1764_v52  ;;  %v1780_v60 = vand.u32 2147483647, %v3014_v45 }
 0x178   : > { %v1201_v63 = vand.u32 2147483647, %v3078_v40  ;;  %v1203_v49 = vand.u32 2147483648, %v3078_v40  ;;  %v1783_v59 = vor.u32 1.1754944e-38, %v1782_v37  ;;  %v1779_v2 = vsel %vm3136_vm11, %v3065_v6, %v1775_v57 }
 0x179   : > { %v1032_v8 = vsub.f32 0.0, %v1003_v33  ;;  %v1180_v39 = vmul.f32 %v2348_v22, %v1179_v29  ;;  %vm1781_vm13 = vcmp.eq.f32.partialorder %v1780_v60, 8.507059e+37  ;;  %vm1197_vm14 = vweird.f32 %v3078_v40 }
 0x17a   : > { %2180 = vmatmul.msk.f32.gmra.mxu3 %vm479_vm0, %v1769_v56  ;;  %vm1202_vm2 = vcmp.eq.f32.partialorder %v1201_v63, 8.507059e+37  ;;  %v1204_v10 = vor.u32 1.1754944e-38, %v1203_v49  ;;  %v1784_v13 = vsel %vm1781_vm13, %v1783_v59, %v1779_v2 }
 0x17b   : > { %v2350_v27 = vpop.eup %2349  ;;  %v1057_v46 = vmul.f32 1.442695, %v1032_v8  ;;  %v1181_v47 = vadd.f32 %v2348_v22, %v1180_v39 }
 0x17c   : > { %v2352_v53 = vpop.eup %2351  ;;  %v3118_v54 = vadd.f32 1.0, %v2350_v27 }
 0x17d   : > { %2353 = vpow2.f32 %v1057_v46  ;;  %v1185_v9 = vsel %vm1184_vm1, %v2348_v22, %v1181_v47  ;;  %v1193_v55 = vmul.f32 %v2352_v53, %v3078_v40  ;;  %vm1198_vm12 = vweird.f32 %v2352_v53  ;;  %v3158_v46 = vpop.f32.mrf.mxu3 }
 0x17e   : > { %2355 = vrcp.f32 %v3118_v54  ;;  %v1005_v19 = vpop.f32.mrf.mxu1  ;;  %v1190_v51 = vsel %vm3106_vm7, %v1189_v48, %v1185_v9  ;;  %vm1199_vm15 = vmor %vm1197_vm14, %vm1198_vm12  ;;  %v1218_v20 = vand.u32 2147483648, %v3118_v54  ;;  %v1216_v40 = vand.u32 2147483647, %v3118_v54 }
 0x17f   : > { %v1006_v61 = vadd.f32 %v2784_v18, %v1005_v19  ;;  %2146 = vmatmul.msk.f32.gmra.mxu2 %vm909_vm5, %v1190_v51  ;;  %v1194_v62 = vsub.f32 1.0, %v1193_v55  ;;  %vm1212_vm4 = vweird.f32 %v3118_v54 }
 0x180   : > { %v1219_v28 = vor.u32 1.1754944e-38, %v1218_v20  ;;  %vm1217_vm7 = vcmp.eq.f32.partialorder %v1216_v40, 8.507059e+37 }
 0x181   : > { %v1033_v0 = vsub.f32 0.0, %v1006_v61  ;;  %v1195_v1 = vmul.f32 %v2352_v53, %v1194_v62 }
 0x182   : > { %2181 = vmatmul.msk.f32.gmra.mxu3 %vm479_vm0, %v1784_v13 }
 0x183   : > { %v2354_v45 = vpop.eup %2353  ;;  %v1059_v3 = vmul.f32 1.442695, %v1033_v0  ;;  %v1196_v4 = vadd.f32 %v2352_v53, %v1195_v1 }
 0x184   : > { %v2356_v5 = vpop.eup %2355  ;;  %v1080_v7 = vadd.f32 1.0, %v2354_v45 }
 0x185   : > { %2357 = vpow2.f32 %v1059_v3  ;;  %v1200_v11 = vsel %vm1199_vm15, %v2352_v53, %v1196_v4  ;;  %v1208_v50 = vmul.f32 %v2356_v5, %v3118_v54  ;;  %vm1213_vm3 = vweird.f32 %v2356_v5  ;;  %v1563_v59 = vpop.f32.mrf.mxu3  ;;  %v3167_v4 = vld [vmem:[%s3364_s9] ss:$0 sm:$0xff] }
 0x186   : > { %2359 = vrcp.f32 %v1080_v7  ;;  %v1008_v14 = vpop.f32.mrf.mxu1  ;;  %v1205_v16 = vsel %vm1202_vm2, %v1204_v10, %v1200_v11  ;;  %vm1214_vm6 = vmor %vm1212_vm4, %vm1213_vm3  ;;  %v1233_v36 = vand.u32 2147483648, %v1080_v7  ;;  %v1231_v39 = vand.u32 2147483647, %v1080_v7 }
 0x187   : > { %v1009_v6 = vadd.f32 %v2784_v18, %v1008_v14  ;;  %2147 = vmatmul.msk.f32.gmra.mxu2 %vm909_vm5, %v1205_v16  ;;  %v1209_v17 = vsub.f32 1.0, %v1208_v50  ;;  %vm1227_vm1 = vweird.f32 %v1080_v7 }
 0x188   : > { %v1234_v27 = vor.u32 1.1754944e-38, %v1233_v36  ;;  %vm1232_vm10 = vcmp.eq.f32.partialorder %v1231_v39, 8.507059e+37 }
 0x189   : > { %v1034_v21 = vsub.f32 0.0, %v1009_v6  ;;  %v1210_v22 = vmul.f32 %v2356_v5, %v1209_v17 }
 0x18b   : > { %v2358_v24 = vpop.eup %2357  ;;  %v1061_v25 = vmul.f32 1.442695, %v1034_v21  ;;  %v1211_v12 = vadd.f32 %v2356_v5, %v1210_v22 }
 0x18c   : > { %v2360_v26 = vpop.eup %2359  ;;  %v1081_v30 = vadd.f32 1.0, %v2358_v24 }
 0x18d   : > { %2361 = vpow2.f32 %v1061_v25  ;;  %v1215_v31 = vsel %vm1214_vm6, %v2356_v5, %v1211_v12  ;;  %v1223_v32 = vmul.f32 %v2360_v26, %v1080_v7  ;;  %vm1228_vm8 = vweird.f32 %v2360_v26 }
 0x18e   : > { %2363 = vrcp.f32 %v1081_v30  ;;  %v1011_v33 = vpop.f32.mrf.mxu1  ;;  %v1220_v29 = vsel %vm1217_vm7, %v1219_v28, %v1215_v31  ;;  %vm1229_vm9 = vmor %vm1227_vm1, %vm1228_vm8  ;;  %v1248_v9 = vand.u32 2147483648, %v1081_v30  ;;  %v1246_v19 = vand.u32 2147483647, %v1081_v30  ;;  %v1566_v28 = vpop.f32.mrf.mxu3 }
 0x18f   : > { %v1012_v34 = vadd.f32 %v2784_v18, %v1011_v33  ;;  %2148 = vmatmul.msk.f32.gmra.mxu2 %vm909_vm5, %v1220_v29  ;;  %v1224_v35 = vsub.f32 1.0, %v1223_v32  ;;  %vm1242_vm12 = vweird.f32 %v1081_v30  ;;  %v1558_v5 = vadd.f32 %v3167_v4, %v3153_v23  ;;  %v2408_v23 = vld [vmem:[%s3360_s5] ss:$0 sm:$0xff] }
 0x190   : > { %v1249_v58 = vor.u32 1.1754944e-38, %v1248_v9  ;;  %vm1247_vm14 = vcmp.eq.f32.partialorder %v1246_v19, 8.507059e+37 }
 0x191   : > { %v1035_v38 = vsub.f32 0.0, %v1012_v34  ;;  %v1225_v8 = vmul.f32 %v2360_v26, %v1224_v35  ;;  %v1583_v17 = vsub.f32 0.0, %v1558_v5 }
 0x193   : > { %v2362_v41 = vpop.eup %2361  ;;  %v1063_v42 = vmul.f32 1.442695, %v1035_v38  ;;  %v1226_v43 = vadd.f32 %v2360_v26, %v1225_v8  ;;  %v1610_v12 = vmul.f32 1.442695, %v1583_v17 }
 0x194   : > { %v2364_v44 = vpop.eup %2363  ;;  %v1082_v15 = vadd.f32 1.0, %v2362_v41 }
 0x195   : > { %2365 = vpow2.f32 %v1063_v42  ;;  %v1230_v47 = vsel %vm1229_vm9, %v2360_v26, %v1226_v43  ;;  %v1238_v48 = vmul.f32 %v2364_v44, %v1081_v30  ;;  %vm1243_vm11 = vweird.f32 %v2364_v44 }
 0x196   : > { %2367 = vrcp.f32 %v1082_v15  ;;  %v1014_v52 = vpop.f32.mrf.mxu1  ;;  %v1235_v53 = vsel %vm1232_vm10, %v1234_v27, %v1230_v47  ;;  %vm1244_vm13 = vmor %vm1242_vm12, %vm1243_vm11  ;;  %v1263_v3 = vand.u32 2147483648, %v1082_v15  ;;  %v1261_v11 = vand.u32 2147483647, %v1082_v15  ;;  %v1569_v9 = vpop.f32.mrf.mxu3 }
 0x197   : > { %v1015_v54 = vadd.f32 %v2784_v18, %v1014_v52  ;;  %2149 = vmatmul.msk.f32.gmra.mxu2 %vm909_vm5, %v1235_v53  ;;  %v1239_v37 = vsub.f32 1.0, %v1238_v48  ;;  %vm1257_vm2 = vweird.f32 %v1082_v15  ;;  %v1561_v30 = vadd.f32 %v3167_v4, %v3158_v46 }
 0x198   : > { %v1264_v6 = vor.u32 1.1754944e-38, %v1263_v3  ;;  %vm1262_vm4 = vcmp.eq.f32.partialorder %v1261_v11, 8.507059e+37  ;;  %v1564_v48 = vadd.f32 %v3167_v4, %v1563_v59  ;;  %v1567_v59 = vadd.f32 %v3167_v4, %v1566_v28 }
 0x199   : > { %v1036_v55 = vsub.f32 0.0, %v1015_v54  ;;  %v1240_v56 = vmul.f32 %v2364_v44, %v1239_v37  ;;  %v1584_v39 = vsub.f32 0.0, %v1561_v30 }
 0x19b   : > { %v2366_v51 = vpop.eup %2365  ;;  %v1065_v57 = vmul.f32 1.442695, %v1036_v55  ;;  %v1241_v60 = vadd.f32 %v2364_v44, %v1240_v56  ;;  %v1612_v46 = vmul.f32 1.442695, %v1584_v39 }
 0x19c   : > { %v2368_v61 = vpop.eup %2367  ;;  %v1083_v62 = vadd.f32 1.0, %v2366_v51 }
 0x19d   : > { %2369 = vpow2.f32 %v1065_v57  ;;  %v1245_v63 = vsel %vm1244_vm13, %v2364_v44, %v1241_v60  ;;  %v1253_v49 = vmul.f32 %v2368_v61, %v1082_v15  ;;  %vm1258_vm15 = vweird.f32 %v2368_v61 }
 0x19e   : > { %2371 = vrcp.f32 %v1083_v62  ;;  %v1017_v0 = vpop.f32.mrf.mxu1  ;;  %v1250_v1 = vsel %vm1247_vm14, %v1249_v58, %v1245_v63  ;;  %vm1259_vm3 = vmor %vm1257_vm2, %vm1258_vm15  ;;  %v1278_v26 = vand.u32 2147483648, %v1083_v62  ;;  %v1276_v33 = vand.u32 2147483647, %v1083_v62 }
 0x19f   : > { %v1018_v2 = vadd.f32 %v2784_v18, %v1017_v0  ;;  %2150 = vmatmul.msk.f32.gmra.mxu2 %vm909_vm5, %v1250_v1  ;;  %v1254_v45 = vsub.f32 1.0, %v1253_v49  ;;  %vm1272_vm7 = vweird.f32 %v1083_v62 }
 0x1a0   : > { %v1279_v8 = vor.u32 1.1754944e-38, %v1278_v26  ;;  %vm1277_vm1 = vcmp.eq.f32.partialorder %v1276_v33, 8.507059e+37 }
 0x1a1   : > { %v1037_v7 = vsub.f32 0.0, %v1018_v2  ;;  %v1255_v10 = vmul.f32 %v2368_v61, %v1254_v45 }
 0x1a3   : > { %v2370_v50 = vpop.eup %2369  ;;  %v1067_v13 = vmul.f32 1.442695, %v1037_v7  ;;  %v1256_v14 = vadd.f32 %v2368_v61, %v1255_v10 }
 0x1a4   : > { %v2372_v18 = vpop.eup %2371  ;;  %v3171_v16 = vadd.f32 1.0, %v2370_v50 }
 0x1a5   : > { %2373 = vpow2.f32 %v1067_v13  ;;  %v1260_v20 = vsel %vm1259_vm3, %v2368_v61, %v1256_v14  ;;  %v1268_v21 = vmul.f32 %v2372_v18, %v1083_v62  ;;  %vm1273_vm6 = vweird.f32 %v2372_v18 }
 0x1a6   : > { %2375 = vrcp.f32 %v3171_v16  ;;  %v1020_v22 = vpop.f32.mrf.mxu1  ;;  %v1265_v40 = vsel %vm1262_vm4, %v1264_v6, %v1260_v20  ;;  %vm1274_vm8 = vmor %vm1272_vm7, %vm1273_vm6  ;;  %v1293_v47 = vand.u32 2147483648, %v3171_v16  ;;  %v1291_v54 = vand.u32 2147483647, %v3171_v16 }
 0x1a7   : > { %v1021_v24 = vadd.f32 %v2408_v23, %v1020_v22  ;;  %2151 = vmatmul.msk.f32.gmra.mxu2 %vm909_vm5, %v1265_v40  ;;  %v1269_v25 = vsub.f32 1.0, %v1268_v21  ;;  %2377 = vpow2.f32 %v1610_v12  ;;  %vm1287_vm10 = vweird.f32 %v3171_v16 }
 0x1a8   : > { %v1294_v60 = vor.u32 1.1754944e-38, %v1293_v47  ;;  %v1585_v61 = vsub.f32 0.0, %v1564_v48  ;;  %vm1292_vm12 = vcmp.eq.f32.partialorder %v1291_v54, 8.507059e+37  ;;  %v1586_v14 = vsub.f32 0.0, %v1567_v59 }
 0x1a9   : > { %v1038_v31 = vsub.f32 0.0, %v1021_v24  ;;  %v1270_v32 = vmul.f32 %v2372_v18, %v1269_v25  ;;  %v1570_v12 = vadd.f32 %v3167_v4, %v1569_v9 }
 0x1aa   : > { %v1614_v2 = vmul.f32 1.442695, %v1585_v61  ;;  %v1616_v40 = vmul.f32 1.442695, %v1586_v14 }
 0x1ab   : > { %v2374_v29 = vpop.eup %2373  ;;  %v1069_v34 = vmul.f32 1.442695, %v1038_v31  ;;  %v1271_v35 = vadd.f32 %v2372_v18, %v1270_v32 }
 0x1ac   : > { %v2376_v36 = vpop.eup %2375  ;;  %v3180_v38 = vadd.f32 1.0, %v2374_v29  ;;  %v1587_v29 = vsub.f32 0.0, %v1570_v12 }
 0x1ad   : > { %2379 = vpow2.f32 %v1069_v34  ;;  %v1275_v41 = vsel %vm1274_vm8, %v2372_v18, %v1271_v35  ;;  %v1283_v42 = vmul.f32 %v2376_v36, %v3171_v16  ;;  %vm1288_vm9 = vweird.f32 %v2376_v36  ;;  %v2378_v37 = vpop.eup %2377  ;;  %v3199_v18 = vpop.f32.mrf.mxu3 }
 0x1ae   : > { %2381 = vrcp.f32 %v3180_v38  ;;  %v1554_v43 = vpop.f32.mrf.mxu1  ;;  %v1280_v44 = vsel %vm1277_vm1, %v1279_v8, %v1275_v41  ;;  %vm1289_vm11 = vmor %vm1287_vm10, %vm1288_vm9  ;;  %v3191_v63 = vadd.f32 1.0, %v2378_v37  ;;  %v1308_v1 = vand.u32 2147483648, %v3180_v38 }
 0x1af   : > { %v1555_v15 = vadd.f32 %v3167_v4, %v1554_v43  ;;  %2152 = vmatmul.msk.f32.gmra.mxu2 %vm909_vm5, %v1280_v44  ;;  %v1284_v27 = vsub.f32 1.0, %v1283_v42  ;;  %2383 = vpow2.f32 %v1612_v46  ;;  %v1306_v3 = vand.u32 2147483647, %v3180_v38 }
 0x1b0   : > { %vm1302_vm14 = vweird.f32 %v3180_v38  ;;  %v1309_v13 = vor.u32 1.1754944e-38, %v1308_v1  ;;  %v1618_v42 = vmul.f32 1.442695, %v1587_v29  ;;  %vm1806_vm9 = vweird.f32 %v3191_v63 }
 0x1b1   : > { %v1582_v52 = vsub.f32 0.0, %v1555_v15  ;;  %v1285_v53 = vmul.f32 %v2376_v36, %v1284_v27  ;;  %vm1307_vm2 = vcmp.eq.f32.partialorder %v1306_v3, 8.507059e+37  ;;  %v1810_v9 = vand.u32 2147483647, %v3191_v63 }
 0x1b3   : > { %v2380_v55 = vpop.eup %2379  ;;  %v1608_v56 = vmul.f32 1.442695, %v1582_v52  ;;  %v1286_v19 = vadd.f32 %v2376_v36, %v1285_v53  ;;  %v3223_v53 = vld [vmem:[%s3366_s11] ss:$0 sm:$0xff] }
 0x1b4   : > { %v2382_v51 = vpop.eup %2381  ;;  %v1086_v57 = vadd.f32 1.0, %v2380_v55  ;;  %v1812_v55 = vand.u32 2147483648, %v3191_v63 }
 0x1b5   : > { %2385 = vpow2.f32 %v1608_v56  ;;  %v1290_v62 = vsel %vm1289_vm11, %v2376_v36, %v1286_v19  ;;  %v1298_v58 = vmul.f32 %v2382_v51, %v3180_v38  ;;  %vm1303_vm13 = vweird.f32 %v2382_v51  ;;  %v2384_v5 = vpop.eup %2383  ;;  %v3234_v56 = vld [vmem:[%s3362_s7] ss:$0 sm:$0xff] }
 0x1b6   : > { %2387 = vrcp.f32 %v1086_v57  ;;  %v1295_v49 = vsel %vm1292_vm12, %v1294_v60, %v1290_v62  ;;  %vm1304_vm15 = vmor %vm1302_vm14, %vm1303_vm13  ;;  %v3201_v17 = vadd.f32 1.0, %v2384_v5  ;;  %v1323_v23 = vand.u32 2147483648, %v1086_v57  ;;  %v1952_v4 = vpop.f32.mrf.mxu3 }
 0x1b7   : > { %2153 = vmatmul.msk.f32.gmra.mxu2 %vm909_vm5, %v1295_v49  ;;  %v1299_v0 = vsub.f32 1.0, %v1298_v58  ;;  %2389 = vrcp.f32 %v3191_v63  ;;  %v1321_v25 = vand.u32 2147483647, %v1086_v57  ;;  %vm1317_vm4 = vweird.f32 %v1086_v57 }
 0x1b8   : > { %2391 = vpow2.f32 %v1614_v2  ;;  %v1324_v32 = vor.u32 1.1754944e-38, %v1323_v23  ;;  %v1950_v62 = vadd.f32 %v3223_v53, %v3199_v18  ;;  %vm1811_vm13 = vcmp.eq.f32.partialorder %v1810_v9, 8.507059e+37 }
 0x1b9   : > { %v1300_v45 = vmul.f32 %v2382_v51, %v1299_v0  ;;  %vm1322_vm7 = vcmp.eq.f32.partialorder %v1321_v25, 8.507059e+37  ;;  %v1813_v49 = vor.u32 1.1754944e-38, %v1812_v55  ;;  %vm1821_vm14 = vweird.f32 %v3201_v17 }
 0x1ba   : > { %v1953_v14 = vadd.f32 %v3223_v53, %v1952_v4 }
 0x1bb   : > { %v2386_v7 = vpop.eup %2385  ;;  %v1301_v10 = vadd.f32 %v2382_v51, %v1300_v45 }
 0x1bc   : > { %v2388_v11 = vpop.eup %2387  ;;  %v1630_v50 = vadd.f32 1.0, %v2386_v7  ;;  %v1825_v7 = vand.u32 2147483647, %v3201_v17 }
 0x1bd   : > { %v1305_v16 = vsel %vm1304_vm15, %v2382_v51, %v1301_v10  ;;  %v1313_v6 = vmul.f32 %v2388_v11, %v1086_v57  ;;  %v3204_v22 = vpop.eup %2389  ;;  %vm1318_vm3 = vweird.f32 %v2388_v11  ;;  %v1827_v10 = vand.u32 2147483648, %v3201_v17 }
 0x1be   : > { %2393 = vrcp.f32 %v1630_v50  ;;  %v1310_v20 = vsel %vm1307_vm2, %v1309_v13, %v1305_v16  ;;  %v2392_v26 = vpop.eup %2391  ;;  %v1802_v28 = vmul.f32 %v3204_v22, %v3191_v63  ;;  %vm1319_vm6 = vmor %vm1317_vm4, %vm1318_vm3  ;;  %v1797_v41 = vand.u32 2147483648, %v1630_v50  ;;  %v1955_v61 = vpop.f32.mrf.mxu3 }
 0x1bf   : > { %2154 = vmatmul.msk.f32.gmra.mxu2 %vm909_vm5, %v1310_v20  ;;  %v1314_v21 = vsub.f32 1.0, %v1313_v6  ;;  %2395 = vrcp.f32 %v3201_v17  ;;  %v3210_v35 = vadd.f32 1.0, %v2392_v26  ;;  %v1795_v44 = vand.u32 2147483647, %v1630_v50 }
 0x1c0   : > { %2397 = vpow2.f32 %v1616_v40  ;;  %v1803_v8 = vsub.f32 1.0, %v1802_v28  ;;  %vm1791_vm1 = vweird.f32 %v1630_v50  ;;  %v1798_v48 = vor.u32 1.1754944e-38, %v1797_v41 }
 0x1c1   : > { %v1315_v24 = vmul.f32 %v2388_v11, %v1314_v21  ;;  %2399 = vrcp.f32 %v3210_v35  ;;  %vm1796_vm10 = vcmp.eq.f32.partialorder %v1795_v44, 8.507059e+37  ;;  %vm1807_vm11 = vweird.f32 %v3204_v22 }
 0x1c2   : > { %v1804_v46 = vmul.f32 %v3204_v22, %v1803_v8  ;;  %2401 = vpow2.f32 %v1618_v42  ;;  %vm3241_vm12 = vmor %vm1806_vm9, %vm1807_vm11  ;;  %vm1826_vm3 = vcmp.eq.f32.partialorder %v1825_v7, 8.507059e+37  ;;  %v1828_v16 = vor.u32 1.1754944e-38, %v1827_v10 }
 0x1c3   : > { %v1316_v30 = vadd.f32 %v2388_v11, %v1315_v24  ;;  %vm1836_vm4 = vweird.f32 %v3210_v35  ;;  %v1840_v24 = vand.u32 2147483647, %v3210_v35  ;;  %v1842_v25 = vand.u32 2147483648, %v3210_v35 }
 0x1c4   : > { %v2394_v31 = vpop.eup %2393  ;;  %v1805_v19 = vadd.f32 %v3204_v22, %v1804_v46  ;;  %v1956_v28 = vadd.f32 %v3223_v53, %v1955_v61 }
 0x1c5   : > { %v1320_v33 = vsel %vm1319_vm6, %v2388_v11, %v1316_v30  ;;  %v1787_v34 = vmul.f32 %v2394_v31, %v1630_v50  ;;  %v3213_v39 = vpop.eup %2395  ;;  %vm1792_vm8 = vweird.f32 %v2394_v31 }
 0x1c6   : > { %v1325_v36 = vsel %vm1322_vm7, %v1324_v32, %v1320_v33  ;;  %v2398_v15 = vpop.eup %2397  ;;  %v1817_v47 = vmul.f32 %v3213_v39, %v3201_v17  ;;  %v1809_v63 = vsel %vm3241_vm12, %v3204_v22, %v1805_v19  ;;  %vm1822_vm15 = vweird.f32 %v3213_v39 }
 0x1c7   : > { %2155 = vmatmul.msk.f32.gmra.mxu2 %vm909_vm5, %v1325_v36  ;;  %v1788_v38 = vsub.f32 1.0, %v1787_v34  ;;  %vm1793_vm5 = vmor %vm1791_vm1, %vm1792_vm8  ;;  %v3226_v54 = vadd.f32 1.0, %v2398_v15  ;;  %v3237_v57 = vpop.eup %2399  ;;  %v1814_v5 = vsel %vm1811_vm13, %v1813_v49, %v1809_v63  ;;  %vm1841_vm8 = vcmp.eq.f32.partialorder %v1840_v24, 8.507059e+37 }
 0x1c8   : > { %v1818_v51 = vsub.f32 1.0, %v1817_v47  ;;  %v2402_v0 = vpop.eup %2401  ;;  %v1832_v2 = vmul.f32 %v3237_v57, %v3210_v35  ;;  %vm1823_vm2 = vmor %vm1821_vm14, %vm1822_vm15  ;;  %vm1837_vm6 = vweird.f32 %v3237_v57  ;;  %v1843_v32 = vor.u32 1.1754944e-38, %v1842_v25 }
 0x1c9   : > { %v1789_v43 = vmul.f32 %v2394_v31, %v1788_v38  ;;  %2403 = vrcp.f32 %v3226_v54  ;;  %v3263_v3 = vadd.f32 1.0, %v2402_v0  ;;  %vm1838_vm7 = vmor %vm1836_vm4, %vm1837_vm6  ;;  %vm1851_vm1 = vweird.f32 %v3226_v54 }
 0x1ca   : > { %v1819_v59 = vmul.f32 %v3213_v39, %v1818_v51  ;;  %v1833_v50 = vsub.f32 1.0, %v1832_v2  ;;  %v1857_v8 = vand.u32 2147483648, %v3226_v54  ;;  %v1855_v41 = vand.u32 2147483647, %v3226_v54 }
 0x1cb   : > { %v1790_v27 = vadd.f32 %v2394_v31, %v1789_v43  ;;  %2405 = vrcp.f32 %v3263_v3  ;;  %vm1866_vm11 = vweird.f32 %v3263_v3  ;;  %v1870_v55 = vand.u32 2147483647, %v3263_v3 }
 0x1cc   : > { %v1820_v11 = vadd.f32 %v3213_v39, %v1819_v59  ;;  %v1958_v6 = vpop.f32.mrf.mxu3  ;;  %v1834_v21 = vmul.f32 %v3237_v57, %v1833_v50  ;;  %v1858_v15 = vor.u32 1.1754944e-38, %v1857_v8 }
 0x1cd   : > { %v1794_v52 = vsel %vm1793_vm5, %v2394_v31, %v1790_v27  ;;  %v1959_v43 = vadd.f32 %v3223_v53, %v1958_v6  ;;  %vm1871_vm14 = vcmp.eq.f32.partialorder %v1870_v55, 8.507059e+37 }
 0x1ce   : > { %v1799_v37 = vsel %vm1796_vm10, %v1798_v48, %v1794_v52  ;;  %v1824_v20 = vsel %vm1823_vm2, %v3213_v39, %v1820_v11  ;;  %v1835_v12 = vadd.f32 %v3237_v57, %v1834_v21  ;;  %vm1856_vm10 = vcmp.eq.f32.partialorder %v1855_v41, 8.507059e+37 }
 0x1cf   : > { %2182 = vmatmul.msk.f32.gmra.mxu3 %vm479_vm0, %v1799_v37  ;;  %v2404_v13 = vpop.eup %2403  ;;  %v1829_v23 = vsel %vm1826_vm3, %v1828_v16, %v1824_v20 }
 0x1d0   : > { %v1847_v22 = vmul.f32 %v2404_v13, %v3226_v54  ;;  %v1839_v29 = vsel %vm1838_vm7, %v3237_v57, %v1835_v12  ;;  %vm1852_vm5 = vweird.f32 %v2404_v13  ;;  %v1872_v54 = vand.u32 2147483648, %v3263_v3 }
 0x1d1   : > { %v2406_v30 = vpop.eup %2405  ;;  %v1844_v38 = vsel %vm1841_vm8, %v1843_v32, %v1839_v29  ;;  %vm1853_vm9 = vmor %vm1851_vm1, %vm1852_vm5 }
 0x1d2   : > { %v1404_v58 = vpop.f32.mrf.mxu2  ;;  %v1848_v26 = vsub.f32 1.0, %v1847_v22  ;;  %v1862_v35 = vmul.f32 %v2406_v30, %v3263_v3  ;;  %vm1867_vm12 = vweird.f32 %v2406_v30  ;;  %v1873_v57 = vor.u32 1.1754944e-38, %v1872_v54 }
 0x1d3   : > { %v1405_v1 = vadd.f32 %v3234_v56, %v1404_v58  ;;  %vm1868_vm13 = vmor %vm1866_vm11, %vm1867_vm12 }
 0x1d4   : > { %v1849_v34 = vmul.f32 %v2404_v13, %v1848_v26  ;;  %v1863_v42 = vsub.f32 1.0, %v1862_v35 }
 0x1d5   : > { %v1997_v45 = vadd.f32 %v1950_v62, %v1405_v1 }
 0x1d6   : > { %v1850_v39 = vadd.f32 %v2404_v13, %v1849_v34  ;;  %v1864_v47 = vmul.f32 %v2406_v30, %v1863_v42 }
 0x1d7   : > { %2013 = vst.msk [vmem:[%s3259_s18] sm:$0xff] %vm479_vm0, %v1997_v45  ;;  %2183 = vmatmul.msk.f32.gmra.mxu3 %vm479_vm0, %v1814_v5  ;;  %v1961_v36 = vpop.f32.mrf.mxu3 }
 0x1d8   : > { %v1854_v46 = vsel %vm1853_vm9, %v2404_v13, %v1850_v39  ;;  %v1865_v9 = vadd.f32 %v2406_v30, %v1864_v47  ;;  %v1962_v19 = vadd.f32 %v3223_v53, %v1961_v36 }
 0x1d9   : > { %v1859_v52 = vsel %vm1856_vm10, %v1858_v15, %v1854_v46 }
 0x1da   : > { %v1407_v18 = vpop.f32.mrf.mxu2  ;;  %v1869_v61 = vsel %vm1868_vm13, %v2406_v30, %v1865_v9 }
 0x1db   : > { %v1408_v17 = vadd.f32 %v3234_v56, %v1407_v18  ;;  %v1874_v58 = vsel %vm1871_vm14, %v1873_v57, %v1869_v61 }
 0x1dd   : > { %v1998_v40 = vadd.f32 %v1953_v14, %v1408_v17 }
 0x1df   : > { %2014 = vst.msk [vmem:[%s3259_s18 + $0x8] sm:$0xff] %vm479_vm0, %v1998_v40  ;;  %2184 = vmatmul.msk.f32.gmra.mxu3 %vm479_vm0, %v1829_v23 }
 0x1e0   : > { %v1964_v37 = vpop.f32.mrf.mxu3 }
 0x1e1   : > { %v1965_v0 = vadd.f32 %v3223_v53, %v1964_v37 }
 0x1e2   : > { %v1410_v31 = vpop.f32.mrf.mxu2 }
 0x1e3   : > { %v1411_v33 = vadd.f32 %v3234_v56, %v1410_v31 }
 0x1e5   : > { %v1999_v4 = vadd.f32 %v1956_v28, %v1411_v33 }
 0x1e7   : > { %2015 = vst.msk [vmem:[%s3259_s18 + $0x10] sm:$0xff] %vm479_vm0, %v1999_v4  ;;  %2185 = vmatmul.msk.f32.gmra.mxu3 %vm479_vm0, %v1844_v38 }
 0x1ea   : > { %v1413_v44 = vpop.f32.mrf.mxu2 }
 0x1eb   : > { %v1414_v27 = vadd.f32 %v3234_v56, %v1413_v44 }
 0x1ed   : > { %v2000_v48 = vadd.f32 %v1959_v43, %v1414_v27  ;;  %v1967_v49 = vpop.f32.mrf.mxu3 }
 0x1ee   : > { %v1968_v2 = vadd.f32 %v3223_v53, %v1967_v49 }
 0x1ef   : > { %2016 = vst.msk [vmem:[%s3259_s18 + $0x18] sm:$0xff] %vm479_vm0, %v2000_v48  ;;  %2186 = vmatmul.msk.f32.gmra.mxu3 %vm479_vm0, %v1859_v52 }
 0x1f2   : > { %v1416_v51 = vpop.f32.mrf.mxu2 }
 0x1f3   : > { %v1417_v60 = vadd.f32 %v3234_v56, %v1416_v51 }
 0x1f5   : > { %v2001_v62 = vadd.f32 %v1962_v19, %v1417_v60  ;;  %v1970_v3 = vpop.f32.mrf.mxu3 }
 0x1f6   : > { %v1971_v10 = vadd.f32 %v3223_v53, %v1970_v3 }
 0x1f7   : > { %2017 = vst.msk [vmem:[%s3259_s18 + $0x20] sm:$0xff] %vm479_vm0, %v2001_v62  ;;  %2187 = vmatmul.msk.f32.gmra.mxu3 %vm479_vm0, %v1874_v58 }
 0x1fa   : > { %v1419_v1 = vpop.f32.mrf.mxu2 }
 0x1fb   : > { %v1420_v63 = vadd.f32 %v3234_v56, %v1419_v1 }
 0x1fd   : > { %v2002_v59 = vadd.f32 %v1965_v0, %v1420_v63  ;;  %v1973_v13 = vpop.f32.mrf.mxu3 }
 0x1fe   : > { %v1974_v18 = vadd.f32 %v3223_v53, %v1973_v13 }
 0x1ff   : > { %2018 = vst.msk [vmem:[%s3259_s18 + $0x28] sm:$0xff] %vm479_vm0, %v2002_v59 }
 0x202   : > { %v1422_v45 = vpop.f32.mrf.mxu2 }
 0x203   : > { %v1423_v5 = vadd.f32 %v3234_v56, %v1422_v45 }
 0x205   : > { %v2003_v7 = vadd.f32 %v1968_v2, %v1423_v5  ;;  %v1976_v20 = vpop.f32.mrf.mxu3 }
 0x206   : > { %v1977_v21 = vadd.f32 %v3223_v53, %v1976_v20 }
 0x207   : > { %2019 = vst.msk [vmem:[%s3259_s18 + $0x30] sm:$0xff] %vm479_vm0, %v2003_v7 }
 0x20a   : > { %v1425_v11 = vpop.f32.mrf.mxu2 }
 0x20b   : > { %v1426_v50 = vadd.f32 %v3234_v56, %v1425_v11 }
 0x20d   : > { %v2004_v14 = vadd.f32 %v1971_v10, %v1426_v50 }
 0x20f   : > { %2020 = vst.msk [vmem:[%s3259_s18 + $0x38] sm:$0xff] %vm479_vm0, %v2004_v14 }
 0x212   : > { %v1428_v16 = vpop.f32.mrf.mxu2 }
 0x213   : > { %v1429_v6 = vadd.f32 %v3234_v56, %v1428_v16 }
 0x215   : > { %v2005_v17 = vadd.f32 %v1974_v18, %v1429_v6 }
 0x217   : > { %2021 = vst.msk [vmem:[%s3259_s18 + $0x40] sm:$0xff] %vm479_vm0, %v2005_v17 }
 0x21a   : > { %v1431_v22 = vpop.f32.mrf.mxu2 }
 0x21b   : > { %v1432_v40 = vadd.f32 %v3234_v56, %v1431_v22 }
 0x21d   : > { %v2006_v23 = vadd.f32 %v1977_v21, %v1432_v40 }
 0x21f   : > { %2022 = vst.msk [vmem:[%s3259_s18 + $0x48] sm:$0xff] %vm479_vm0, %v2006_v23 }
 0x222   : > { %v1434_v24 = vpop.f32.mrf.mxu2 }
 0x223   : > { %v1435_v26 = vadd.f32 %v3234_v56, %v1434_v24 }
 0x22a   : > { %v1437_v25 = vpop.f32.mrf.mxu2 }
 0x22b   : > { %v1438_v33 = vadd.f32 %v3234_v56, %v1437_v25 }
 0x232   : > { %v1440_v31 = vpop.f32.mrf.mxu2 }
 0x233   : > { %v1441_v36 = vadd.f32 %v3234_v56, %v1440_v31 }
 0x23a   : > { %v1443_v38 = vpop.f32.mrf.mxu2 }
 0x23b   : > { %v1444_v41 = vadd.f32 %v3234_v56, %v1443_v38 }
 0x242   : > { %v1446_v44 = vpop.f32.mrf.mxu2 }
 0x243   : > { %v1447_v27 = vadd.f32 %v3234_v56, %v1446_v44 }
 0x24a   : > { %v1449_v48 = vpop.f32.mrf.mxu2 }
 0x24b   : > { %v1450_v54 = vadd.f32 %v3234_v56, %v1449_v48 }
 0x252   : > { %v1979_v12 = vpop.f32.mrf.mxu3 }
 0x253   : > { %v1980_v30 = vadd.f32 %v3223_v53, %v1979_v12 }
 0x255   : > { %v2007_v28 = vadd.f32 %v1980_v30, %v1435_v26 }
 0x257   : > { %2023 = vst.msk [vmem:[%s3259_s18 + $0x50] sm:$0xff] %vm479_vm0, %v2007_v28 }
 0x25a   : > { %v1982_v32 = vpop.f32.mrf.mxu3 }
 0x25b   : > { %v1983_v29 = vadd.f32 %v3223_v53, %v1982_v32 }
 0x25d   : > { %v2008_v34 = vadd.f32 %v1983_v29, %v1438_v33 }
 0x25f   : > { %2024 = vst.msk [vmem:[%s3259_s18 + $0x58] sm:$0xff] %vm479_vm0, %v2008_v34 }
 0x262   : > { %v1985_v35 = vpop.f32.mrf.mxu3 }
 0x263   : > { %v1986_v4 = vadd.f32 %v3223_v53, %v1985_v35 }
 0x265   : > { %v2009_v8 = vadd.f32 %v1986_v4, %v1441_v36 }
 0x267   : > { %2025 = vst.msk [vmem:[%s3259_s18 + $0x60] sm:$0xff] %vm479_vm0, %v2009_v8 }
 0x26a   : > { %v1988_v39 = vpop.f32.mrf.mxu3 }
 0x26b   : > { %v1989_v42 = vadd.f32 %v3223_v53, %v1988_v39 }
 0x26d   : > { %v2010_v43 = vadd.f32 %v1989_v42, %v1444_v41 }
 0x26f   : > { %2026 = vst.msk [vmem:[%s3259_s18 + $0x68] sm:$0xff] %vm479_vm0, %v2010_v43 }
 0x272   : > { %v1991_v15 = vpop.f32.mrf.mxu3 }
 0x273   : > { %v1992_v46 = vadd.f32 %v3223_v53, %v1991_v15 }
 0x275   : > { %v2011_v47 = vadd.f32 %v1992_v46, %v1447_v27 }
 0x277   : > { %2027 = vst.msk [vmem:[%s3259_s18 + $0x70] sm:$0xff] %vm479_vm0, %v2011_v47 }
 0x27a   : > { %v1994_v52 = vpop.f32.mrf.mxu3 }
 0x27b   : > { %v1995_v37 = vadd.f32 %v3223_v53, %v1994_v52 }
 0x27d   : > { %v2012_v9 = vadd.f32 %v1995_v37, %v1450_v54 }
 0x27f   : > { %2028 = vst.msk [vmem:[%s3259_s18 + $0x78] sm:$0xff] %vm479_vm0, %v2012_v9 }
 0x280 PF: > { %s22_s21 = sadd.s32 1, %s2415_s21  }
 0x281   : > { %p19_p4 = scmp.ge.s32.totalorder %s22_s21, 4  }
 0x283   :  { %21 = sbr.rel (!%p19_p4) target bundleno = 1 (0x1), region = 101 }

</bundles_post_ra>
